<compile_context>
chip_gen: v5e
topology: v5e:2x2
jax: 0.10.0
libtpu: 0.0.40
codegen_flags: <defaults>
</compile_context>

<pallas_src>
import functools
import math

import jax
import jax.numpy as jnp
from jax import lax
from jax.experimental import pallas as pl
from jax.experimental.pallas import tpu as pltpu


_TM_MAX = 256                    # max row tile (N*OH*OW axis)
_VMEM_LIMIT = 48 * 1024 * 1024   # <= v7x's 64 MiB/TC, safe on v5e/v6e too


def _round_up(x, m):
    return ((x + m - 1) // m) * m


def _m_tiling(M):
    """Row tile / padded rows: TM multiple of 8, capped at _TM_MAX."""
    TM = min(_TM_MAX, _round_up(max(M, 1), 8))
    Mp = _round_up(M, TM)
    return Mp, TM


def _k_tiling(K):
    """Pick (Kp, TK): padded contraction size and K-tile with Kp % TK == 0."""
    Kp = _round_up(K, 128)
    if Kp <= 1024:
        return Kp, Kp                       # single K step
    for tk in (512, 640, 768, 384, 896, 1024, 256):
        if Kp % tk == 0:
            return Kp, tk
    return _round_up(Kp, 512), 512          # fallback: pad to 512 multiple


# ----------------------------------------------------------------------------
# Pallas kernels
# ----------------------------------------------------------------------------
def _mm_kernel(a_ref, w_ref, b_ref, *refs, nk, tm, m_true, relu, emit_stats):
    """Y = A @ W + bias (+ReLU).  Grid = (M tiles [parallel], K tiles [arbitrary]).

    bf16 inputs, f32 accumulator scratch.  When emit_stats, the epilogue also
    writes per-channel sum / sum-of-squares over the *valid* rows of this M
    tile (padded rows masked out) for fused training-mode BatchNorm.
    """
    if emit_stats:
        y_ref, s_ref, acc_ref = refs
    else:
        y_ref, acc_ref = refs

    # NOTE: program_id must be read at the top level of the kernel body, NOT
    # inside a pl.when branch (cond branch jaxprs keep the primitive and the
    # interpret/CPU lowering path cannot resolve it).
    i = pl.program_id(0)
    k = pl.program_id(1)

    @pl.when(k == 0)
    def _():
        acc_ref[...] = jnp.zeros_like(acc_ref)

    acc_ref[...] += jnp.dot(a_ref[...], w_ref[...],
                            preferred_element_type=jnp.float32)

    @pl.when(k == nk - 1)
    def _():
        y = acc_ref[...] + b_ref[...]
        if relu:
            y = jnp.maximum(y, 0.0)
        y_ref[...] = y
        if emit_stats:
            rows = lax.broadcasted_iota(jnp.int32, (tm, 1), 0) + i * tm
            mask = (rows < m_true).astype(jnp.float32)
            ym = y * mask
            s1 = jnp.sum(ym, axis=0, keepdims=True)        # (1, Np)
            s2 = jnp.sum(ym * ym, axis=0, keepdims=True)   # (1, Np)
            rid = lax.broadcasted_iota(jnp.int32, (8, 1), 0)
            s_ref[...] = (jnp.where(rid == 0, s1, 0.0) +
                          jnp.where(rid == 1, s2, 0.0))     # (8, Np)


def _make_apply_kernel(has_res, res_bn, relu):
    """out = relu?( scale*y + shift [+ residual | + rscale*res + rshift] )."""
    def _finish(v):
        return jnp.maximum(v, 0.0) if relu else v

    if has_res and res_bn:
        def kernel(y_ref, s_ref, b_ref, r_ref, rs_ref, rb_ref, o_ref):
            v = y_ref[...] * s_ref[...] + b_ref[...]
            v = v + (r_ref[...] * rs_ref[...] + rb_ref[...])
            o_ref[...] = _finish(v)
    elif has_res:
        def kernel(y_ref, s_ref, b_ref, r_ref, o_ref):
            v = y_ref[...] * s_ref[...] + b_ref[...] + r_ref[...]
            o_ref[...] = _finish(v)
    else:
        def kernel(y_ref, s_ref, b_ref, o_ref):
            v = y_ref[...] * s_ref[...] + b_ref[...]
            o_ref[...] = _finish(v)
    return kernel


# ----------------------------------------------------------------------------
# Kernel builders (cached per static shape/flag combination)
# ----------------------------------------------------------------------------
@functools.lru_cache(maxsize=None)
def _build_matmul(Mp, Kp, Np, TM, TK, m_true, relu, emit_stats):
    nm, nk = Mp // TM, Kp // TK
    kernel = functools.partial(_mm_kernel, nk=nk, tm=TM, m_true=m_true,
                               relu=relu, emit_stats=emit_stats)
    in_specs = [
        pl.BlockSpec((TM, TK), lambda i, k: (i, k)),   # A  (bf16)
        pl.BlockSpec((TK, Np), lambda i, k: (k, 0)),   # W  (bf16)
        pl.BlockSpec((1, Np), lambda i, k: (0, 0)),    # bias (f32)
    ]
    if emit_stats:
        out_shape = (jax.ShapeDtypeStruct((Mp, Np), jnp.float32),
                     jax.ShapeDtypeStruct((nm * 8, Np), jnp.float32))
        out_specs = (pl.BlockSpec((TM, Np), lambda i, k: (i, 0)),
                     pl.BlockSpec((8, Np), lambda i, k: (i, 0)))
    else:
        out_shape = jax.ShapeDtypeStruct((Mp, Np), jnp.float32)
        out_specs = pl.BlockSpec((TM, Np), lambda i, k: (i, 0))
    fn = pl.pallas_call(
        kernel,
        out_shape=out_shape,
        grid=(nm, nk),
        in_specs=in_specs,
        out_specs=out_specs,
        scratch_shapes=[pltpu.VMEM((TM, Np), jnp.float32)],
        compiler_params=pltpu.CompilerParams(
            dimension_semantics=("parallel", "arbitrary"),
            vmem_limit_bytes=_VMEM_LIMIT),
    )
    return jax.jit(fn)


@functools.lru_cache(maxsize=None)
def _build_apply(Mp, Np, TM, has_res, res_bn, relu):
    nm = Mp // TM
    row = pl.BlockSpec((TM, Np), lambda i: (i, 0))
    vec = pl.BlockSpec((1, Np), lambda i: (0, 0))
    in_specs = [row, vec, vec]
    if has_res:
        in_specs.append(row)
        if res_bn:
            in_specs += [vec, vec]
    fn = pl.pallas_call(
        _make_apply_kernel(has_res, res_bn, relu),
        out_shape=jax.ShapeDtypeStruct((Mp, Np), jnp.float32),
        grid=(nm,),
        in_specs=in_specs,
        out_specs=row,
        compiler_params=pltpu.CompilerParams(
            dimension_semantics=("parallel",),
            vmem_limit_bytes=_VMEM_LIMIT),
    )
    return jax.jit(fn)


# ----------------------------------------------------------------------------
# Conv lowering (im2col glue in JAX, matmul/BN/residual/ReLU in Pallas)
# ----------------------------------------------------------------------------
def _im2col(x, kh, kw, stride, padding, dilation):
    N, H, W, C = x.shape
    xp = jnp.pad(x, ((0, 0), (padding, padding), (padding, padding), (0, 0)))
    Hp, Wp = H + 2 * padding, W + 2 * padding
    OH = (Hp - dilation * (kh - 1) - 1) // stride + 1
    OW = (Wp - dilation * (kw - 1) - 1) // stride + 1
    cols = []
    for i in range(kh):
        for j in range(kw):
            hi, wi = i * dilation, j * dilation
            patch = xp[:, hi: hi + stride * (OH - 1) + 1: stride,
                          wi: wi + stride * (OW - 1) + 1: stride, :]
            cols.append(patch)
    cols = jnp.concatenate(cols, axis=-1)                 # (N, OH, OW, kh*kw*C)
    return cols.reshape(N * OH * OW, kh * kw * C), (N, OH, OW)


def _prep_conv(x, w, bias, stride, padding, dilation):
    """im2col in bf16, pad M/K/N to tile multiples, prepare bf16 weight + f32 bias."""
    kh, kw, cin, cout = w.shape
    cols, (N, OH, OW) = _im2col(x.astype(jnp.bfloat16), kh, kw,
                                stride, padding, dilation)
    M, K = cols.shape
    Mp, TM = _m_tiling(M)
    Kp, TK = _k_tiling(K)
    Np = _round_up(cout, 128)
    a = jnp.pad(cols, ((0, Mp - M), (0, Kp - K)))
    wm = jnp.pad(w.reshape(kh * kw * cin, cout).astype(jnp.bfloat16),
                 ((0, Kp - K), (0, Np - cout)))
    b = bias if bias is not None else jnp.zeros((cout,), jnp.float32)
    bp = jnp.pad(b.astype(jnp.float32), (0, Np - cout)).reshape(1, Np)
    return a, wm, bp, (N, OH, OW, M, Mp, TM, Kp, TK, cout, Np)


def _bn_scale_shift(stats, m_true, gamma, beta, Np):
    """Tiny per-channel reduction of Pallas stats into BN scale/shift (f32)."""
    st = stats.reshape(-1, 8, Np)
    s1 = jnp.sum(st[:, 0, :], axis=0)
    s2 = jnp.sum(st[:, 1, :], axis=0)
    mean = s1 / m_true
    var = jnp.maximum(s2 / m_true - mean * mean, 0.0)     # biased, like torch
    g = jnp.pad(gamma.astype(jnp.float32), (0, Np - gamma.shape[0]))
    b = jnp.pad(beta.astype(jnp.float32), (0, Np - beta.shape[0]))
    scale = g * lax.rsqrt(var + 1e-5)
    shift = b - mean * scale
    return scale.reshape(1, Np), shift.reshape(1, Np)


def conv2d_act(x, w, bias=None, stride=1, padding=0, dilation=1, relu=False):
    """Conv + bias (+ReLU), no BatchNorm — fully fused in the matmul epilogue."""
    a, wm, bp, (N, OH, OW, M, Mp, TM, Kp, TK, cout, Np) = _prep_conv(
        x, w, bias, stride, padding, dilation)
    y = _build_matmul(Mp, Kp, Np, TM, TK, M, bool(relu), False)(a, wm, bp)
    return y[:M, :cout].reshape(N, OH, OW, cout)


def _conv_mm_stats(x, w, bias, stride, padding, dilation):
    """Conv matmul that also emits per-channel BN statistics."""
    a, wm, bp, meta = _prep_conv(x, w, bias, stride, padding, dilation)
    (_, _, _, M, Mp, TM, Kp, TK, _, Np) = meta
    y, stats = _build_matmul(Mp, Kp, Np, TM, TK, M, False, True)(a, wm, bp)
    return y, stats, meta


def conv2d_bn_act(x, w, bias, bn, stride=1, padding=0, dilation=1, relu=True):
    """Conv (+bias) + training-mode BatchNorm (+ReLU): matmul+stats, then apply."""
    y, stats, (N, OH, OW, M, Mp, TM, Kp, TK, cout, Np) = _conv_mm_stats(
        x, w, bias, stride, padding, dilation)
    scale, shift = _bn_scale_shift(stats, M, bn["gamma"], bn["beta"], Np)
    out = _build_apply(Mp, Np, TM, False, False, bool(relu))(y, scale, shift)
    return out[:M, :cout].reshape(N, OH, OW, cout)


# ----------------------------------------------------------------------------
# JAX glue ops (window / gather ops; negligible FLOPs)
# ----------------------------------------------------------------------------
def maxpool_3x3_s2_p1(x):
    # TODO(synk): 3x3 max-pool is window glue; kept as lax.reduce_window, not Pallas.
    return lax.reduce_window(x, -jnp.inf, lax.max,
                             window_dimensions=(1, 3, 3, 1),
                             window_strides=(1, 2, 2, 1),
                             padding=((0, 0), (1, 1), (1, 1), (0, 0)))


def bilinear_resize(x, out_h, out_w):
    # F.interpolate(mode='bilinear', align_corners=True) on NHWC.
    # TODO(synk): gather-based resize kept in plain JAX (no clean Pallas gather win here).
    N, H, W, C = x.shape
    ys = jnp.zeros((out_h,), jnp.float32) if H == 1 else jnp.linspace(0.0, float(H - 1), out_h)
    xs = jnp.zeros((out_w,), jnp.float32) if W == 1 else jnp.linspace(0.0, float(W - 1), out_w)
    y0 = jnp.floor(ys).astype(jnp.int32)
    y1 = jnp.minimum(y0 + 1, H - 1)
    x0 = jnp.floor(xs).astype(jnp.int32)
    x1 = jnp.minimum(x0 + 1, W - 1)
    wy = (ys - y0.astype(jnp.float32))[None, :, None, None]
    wx = (xs - x0.astype(jnp.float32))[None, None, :, None]
    tl = x[:, y0][:, :, x0]
    tr = x[:, y0][:, :, x1]
    bl = x[:, y1][:, :, x0]
    br = x[:, y1][:, :, x1]
    top = tl * (1.0 - wx) + tr * wx
    bot = bl * (1.0 - wx) + br * wx
    return top * (1.0 - wy) + bot * wy


# ----------------------------------------------------------------------------
# Deterministic parameter construction (synthetic init, shapes from the module)
# ----------------------------------------------------------------------------
class _KeyGen:
    def __init__(self, key):
        self._key = key

    def __call__(self):
        self._key, sub = jax.random.split(self._key)
        return sub


def _conv_w(kg, cin, cout, k):
    std = math.sqrt(2.0 / (cout * k * k))          # kaiming normal, fan_out, relu
    return std * jax.random.normal(kg(), (k, k, cin, cout), dtype=jnp.float32)


def _conv_b(kg, cin, cout, k):
    bound = 1.0 / math.sqrt(cin * k * k)
    return jax.random.uniform(kg(), (cout,), dtype=jnp.float32, minval=-bound, maxval=bound)


def _bn_p(c):
    return {"gamma": jnp.ones((c,), jnp.float32), "beta": jnp.zeros((c,), jnp.float32)}


def _bottleneck_params(kg, inplanes, planes, stride, need_down):
    p = {
        "conv1_w": _conv_w(kg, inplanes, planes, 1), "bn1": _bn_p(planes),
        "conv2_w": _conv_w(kg, planes, planes, 3), "bn2": _bn_p(planes),
        "conv3_w": _conv_w(kg, planes, planes * 4, 1), "bn3": _bn_p(planes * 4),
        "stride": stride,
    }
    if need_down:
        p["down_w"] = _conv_w(kg, inplanes, planes * 4, 1)
        p["down_bn"] = _bn_p(planes * 4)
    return p


def _make_layer_params(kg, inplanes, planes, blocks, stride):
    layer = []
    need_down = (stride != 1) or (inplanes != planes * 4)
    layer.append(_bottleneck_params(kg, inplanes, planes, stride, need_down))
    inplanes = planes * 4
    for _ in range(1, blocks):
        layer.append(_bottleneck_params(kg, inplanes, planes, 1, False))
    return layer, inplanes


def _aspp_params(kg, in_channel=2048, depth=256):
    return {
        "conv_w": _conv_w(kg, in_channel, depth, 1), "conv_b": _conv_b(kg, in_channel, depth, 1),
        "a1_w": _conv_w(kg, in_channel, depth, 1), "a1_b": _conv_b(kg, in_channel, depth, 1),
        "a6_w": _conv_w(kg, in_channel, depth, 3), "a6_b": _conv_b(kg, in_channel, depth, 3),
        "a12_w": _conv_w(kg, in_channel, depth, 3), "a12_b": _conv_b(kg, in_channel, depth, 3),
        "a18_w": _conv_w(kg, in_channel, depth, 3), "a18_b": _conv_b(kg, in_channel, depth, 3),
        "out_w": _conv_w(kg, depth * 5, depth, 1), "out_b": _conv_b(kg, depth * 5, depth, 1),
    }


def init_deeplab_params(seed=0, class_number=18):
    kg = _KeyGen(jax.random.PRNGKey(seed))
    params = {"conv1_w": _conv_w(kg, 3, 64, 7), "bn1": _bn_p(64)}
    inplanes = 64
    params["layer1"], inplanes = _make_layer_params(kg, inplanes, 64, 3, 1)
    params["layer2"], inplanes = _make_layer_params(kg, inplanes, 128, 4, 2)
    params["layer3"], inplanes = _make_layer_params(kg, inplanes, 256, 6, 2)
    params["layer4"], inplanes = _make_layer_params(kg, inplanes, 512, 3, 2)
    params["aspp"] = _aspp_params(kg, 2048, 256)
    params["low1_w"] = _conv_w(kg, 64, 32, 1); params["low1_b"] = _conv_b(kg, 64, 32, 1); params["low1_bn"] = _bn_p(32)
    params["low3_w"] = _conv_w(kg, 256, 64, 1); params["low3_b"] = _conv_b(kg, 256, 64, 1); params["low3_bn"] = _bn_p(64)
    params["low4_w"] = _conv_w(kg, 512, 128, 1); params["low4_b"] = _conv_b(kg, 512, 128, 1); params["low4_bn"] = _bn_p(128)
    params["cat4_w"] = _conv_w(kg, 256 + 128, 256, 3); params["cat4_b"] = _conv_b(kg, 384, 256, 3); params["cat4_bn"] = _bn_p(256)
    params["cat3a_w"] = _conv_w(kg, 256 + 64, 256, 3); params["cat3a_b"] = _conv_b(kg, 320, 256, 3); params["cat3a_bn"] = _bn_p(256)
    params["cat3b_w"] = _conv_w(kg, 256, 64, 3); params["cat3b_b"] = _conv_b(kg, 256, 64, 3); params["cat3b_bn"] = _bn_p(64)
    params["cat1a_w"] = _conv_w(kg, 64 + 32, 64, 3); params["cat1a_b"] = _conv_b(kg, 96, 64, 3); params["cat1a_bn"] = _bn_p(64)
    params["cat1b_w"] = _conv_w(kg, 64, class_number, 3); params["cat1b_b"] = _conv_b(kg, 64, class_number, 3)
    return params


# ----------------------------------------------------------------------------
# Forward pass
# ----------------------------------------------------------------------------
def _bottleneck_forward(x, p):
    out = conv2d_bn_act(x, p["conv1_w"], None, p["bn1"], 1, 0, 1, relu=True)
    out = conv2d_bn_act(out, p["conv2_w"], None, p["bn2"], p["stride"], 1, 1, relu=True)
    # conv3 + bn3 + residual-add + relu: matmul emits BN stats; one fused apply
    # kernel does scale/shift for the main path, BN for the downsample path (if
    # any), the residual add, and the final ReLU (no separate add+ReLU pass).
    y3, st3, (N, OH, OW, M, Mp, TM, Kp, TK, cout, Np) = _conv_mm_stats(
        out, p["conv3_w"], None, 1, 0, 1)
    sc3, sh3 = _bn_scale_shift(st3, M, p["bn3"]["gamma"], p["bn3"]["beta"], Np)
    if "down_w" in p:
        yd, std, _ = _conv_mm_stats(x, p["down_w"], None, p["stride"], 0, 1)
        scd, shd = _bn_scale_shift(std, M, p["down_bn"]["gamma"], p["down_bn"]["beta"], Np)
        out2 = _build_apply(Mp, Np, TM, True, True, True)(y3, sc3, sh3, yd, scd, shd)
    else:
        ident = jnp.pad(x.reshape(M, cout).astype(jnp.float32),
                        ((0, Mp - M), (0, Np - cout)))
        out2 = _build_apply(Mp, Np, TM, True, False, True)(y3, sc3, sh3, ident)
    return out2[:M, :cout].reshape(N, OH, OW, cout)


def _run_layer(x, layer_params):
    for p in layer_params:
        x = _bottleneck_forward(x, p)
    return x


def _aspp_forward(x, p):
    N, H, W, _ = x.shape
    img = jnp.mean(x, axis=(1, 2), keepdims=True)                 # AdaptiveAvgPool2d((1,1))
    img = conv2d_act(img, p["conv_w"], p["conv_b"], relu=True)
    img = bilinear_resize(img, H, W)
    a1 = conv2d_act(x, p["a1_w"], p["a1_b"], relu=True)
    # TODO(synk): dilated 3x3 im2col (K=9*2048) is still materialized in HBM;
    # K-tiling (TK=512) + bf16 keep it pipelined/VMEM-bounded instead.
    a6 = conv2d_act(x, p["a6_w"], p["a6_b"], padding=3, dilation=3, relu=True)
    a12 = conv2d_act(x, p["a12_w"], p["a12_b"], padding=6, dilation=6, relu=True)
    a18 = conv2d_act(x, p["a18_w"], p["a18_b"], padding=9, dilation=9, relu=True)
    cat = jnp.concatenate([img, a1, a6, a12, a18], axis=-1)
    return conv2d_act(cat, p["out_w"], p["out_b"], relu=True)


def deeplab_v3_forward(params, x_nchw):
    x = jnp.transpose(x_nchw, (0, 2, 3, 1)).astype(jnp.float32)   # NCHW -> NHWC
    H0, W0 = x.shape[1], x.shape[2]

    # ResNet-50 encoder
    x1 = conv2d_bn_act(x, params["conv1_w"], None, params["bn1"],
                       stride=2, padding=3, dilation=1, relu=True)  # (N, H/2, W/2, 64)
    x2 = maxpool_3x3_s2_p1(x1)                                       # (N, H/4, W/4, 64)
    x3 = _run_layer(x2, params["layer1"])                            # 256 ch, H/4
    x4 = _run_layer(x3, params["layer2"])                            # 512 ch, H/8
    x5 = _run_layer(x4, params["layer3"])                            # 1024 ch, H/16
    xf = _run_layer(x5, params["layer4"])                            # 2048 ch, H/32

    xa = _aspp_forward(xf, params["aspp"])                           # 256 ch, H/32

    low1 = conv2d_bn_act(x1, params["low1_w"], params["low1_b"], params["low1_bn"], relu=True)
    low3 = conv2d_bn_act(x3, params["low3_w"], params["low3_b"], params["low3_bn"], relu=True)
    low4 = conv2d_bn_act(x4, params["low4_w"], params["low4_b"], params["low4_bn"], relu=True)

    d4 = bilinear_resize(xa, low4.shape[1], low4.shape[2])
    xc = conv2d_bn_act(jnp.concatenate([low4, d4], axis=-1),
                       params["cat4_w"], params["cat4_b"], params["cat4_bn"],
                       padding=1, relu=True)

    d3 = bilinear_resize(xc, low3.shape[1], low3.shape[2])
    xc = conv2d_bn_act(jnp.concatenate([low3, d3], axis=-1),
                       params["cat3a_w"], params["cat3a_b"], params["cat3a_bn"],
                       padding=1, relu=True)
    xc = conv2d_bn_act(xc, params["cat3b_w"], params["cat3b_b"], params["cat3b_bn"],
                       padding=1, relu=True)

    d1 = bilinear_resize(xc, low1.shape[1], low1.shape[2])
    xc = conv2d_bn_act(jnp.concatenate([low1, d1], axis=-1),
                       params["cat1a_w"], params["cat1a_b"], params["cat1a_bn"],
                       padding=1, relu=True)
    xc = conv2d_act(xc, params["cat1b_w"], params["cat1b_b"], padding=1, relu=False)

    score = bilinear_resize(xc, H0, W0)
    return jnp.transpose(score, (0, 3, 1, 2))                        # NHWC -> NCHW


# ----------------------------------------------------------------------------
if __name__ == "__main__":
    # small input: batch=2, 3 channels, 64x64 spatial (5 downsample stages -> 2x2)
    x = jax.random.normal(jax.random.PRNGKey(0), (2, 3, 64, 64), dtype=jnp.float32)
    params = init_deeplab_params(seed=0, class_number=18)

    out = deeplab_v3_forward(params, x)
    out = jax.block_until_ready(out)

    assert out.shape == (2, 18, 64, 64), out.shape
    assert out.dtype == jnp.float32
    assert bool(jnp.all(jnp.isfinite(out)))
    print("KERNEL_OK")
</pallas_src>

<mosaic_0001>
module attributes {stable_mosaic.version = 11 : i64} {
  func.func @_mm_kernel(%arg0: i32, %arg1: i32, %arg2: memref<256x256xbf16, #tpu.memory_space<vmem>>, %arg3: memref<256x128xbf16, #tpu.memory_space<vmem>>, %arg4: memref<1x128xf32, #tpu.memory_space<vmem>>, %arg5: memref<256x128xf32, #tpu.memory_space<vmem>>, %arg6: memref<8x128xf32, #tpu.memory_space<vmem>>, %arg7: memref<256x128xf32, #tpu.memory_space<vmem>>) attributes {dimension_semantics = [#tpu.dimension_semantics<parallel>, #tpu.dimension_semantics<arbitrary>], iteration_bounds = array<i64: 8, 1>, scalar_prefetch = 0 : i64, scratch_operands = 1 : i64, tpu.core_type = #tpu.core_type<tc>, window_params = [{transform_indices = @transform_0, window_bounds = array<i64: 256, 256>}, {transform_indices = @transform_1, window_bounds = array<i64: 256, 128>}, {pipeline_mode = #tpu.pipeline_mode<synchronous>, transform_indices = @transform_2, window_bounds = array<i64: 1, 128>}, {transform_indices = @transform_3, window_bounds = array<i64: 256, 128>}, {transform_indices = @transform_4, window_bounds = array<i64: 8, 128>}]} {
    %c0_i32 = arith.constant 0 : i32
    %0 = arith.cmpi eq, %arg1, %c0_i32 : i32
    %1 = arith.extui %0 : i1 to i32
    %c0_i32_0 = arith.constant 0 : i32
    %2 = arith.cmpi ne, %1, %c0_i32_0 : i32
    scf.if %2 {
      %cst_10 = arith.constant 0.000000e+00 : f32
      %12 = vector.broadcast %cst_10 : f32 to vector<256x128xf32>
      %c0_11 = arith.constant 0 : index
      %c0_12 = arith.constant 0 : index
      %13 = vector.load %arg7[%c0_11, %c0_12] : memref<256x128xf32, #tpu.memory_space<vmem>>, vector<256x128xf32>
      tpu.vector_store %arg7[%c0_11, %c0_12], %12 {strides = array<i32>} : memref<256x128xf32, #tpu.memory_space<vmem>>, vector<256x128xf32>,
    } else {
    }
    %c0 = arith.constant 0 : index
    %c0_1 = arith.constant 0 : index
    %3 = vector.load %arg7[%c0, %c0_1] : memref<256x128xf32, #tpu.memory_space<vmem>>, vector<256x128xf32>
    %c0_2 = arith.constant 0 : index
    %c0_3 = arith.constant 0 : index
    %4 = vector.load %arg2[%c0_2, %c0_3] : memref<256x256xbf16, #tpu.memory_space<vmem>>, vector<256x256xbf16>
    %c0_4 = arith.constant 0 : index
    %c0_5 = arith.constant 0 : index
    %5 = vector.load %arg3[%c0_4, %c0_5] : memref<256x128xbf16, #tpu.memory_space<vmem>>, vector<256x128xbf16>
    %cst = arith.constant dense<0.000000e+00> : vector<256x128xf32>
    %6 = tpu.matmul %4, %5, %cst {dimension_numbers = #tpu.dot_dimension_numbers<[1], [0], [0], [1], [0, 0, 1, 1], [], []>} : vector<256x256xbf16>, vector<256x128xbf16>, vector<256x128xf32> -> vector<256x128xf32>
    %7 = arith.addf %3, %6 : vector<256x128xf32>
    %c0_6 = arith.constant 0 : index
    %c0_7 = arith.constant 0 : index
    %8 = vector.load %arg7[%c0_6, %c0_7] : memref<256x128xf32, #tpu.memory_space<vmem>>, vector<256x128xf32>
    tpu.vector_store %arg7[%c0_6, %c0_7], %7 {strides = array<i32>} : memref<256x128xf32, #tpu.memory_space<vmem>>, vector<256x128xf32>,
    %c0_i32_8 = arith.constant 0 : i32
    %9 = arith.cmpi eq, %arg1, %c0_i32_8 : i32
    %10 = arith.extui %9 : i1 to i32
    %c0_i32_9 = arith.constant 0 : i32
    %11 = arith.cmpi ne, %10, %c0_i32_9 : i32
    scf.if %11 {
      %c0_10 = arith.constant 0 : index
      %c0_11 = arith.constant 0 : index
      %12 = vector.load %arg7[%c0_10, %c0_11] : memref<256x128xf32, #tpu.memory_space<vmem>>, vector<256x128xf32>
      %c0_12 = arith.constant 0 : index
      %c0_13 = arith.constant 0 : index
      %13 = vector.load %arg4[%c0_12, %c0_13] : memref<1x128xf32, #tpu.memory_space<vmem>>, vector<1x128xf32>
      %14 = vector.broadcast %13 : vector<1x128xf32> to vector<256x128xf32>
      %15 = arith.addf %12, %14 : vector<256x128xf32>
      %c0_14 = arith.constant 0 : index
      %c0_15 = arith.constant 0 : index
      %16 = vector.load %arg5[%c0_14, %c0_15] : memref<256x128xf32, #tpu.memory_space<vmem>>, vector<256x128xf32>
      tpu.vector_store %arg5[%c0_14, %c0_15], %15 {strides = array<i32>} : memref<256x128xf32, #tpu.memory_space<vmem>>, vector<256x128xf32>,
      %17 = tpu.iota {dimensions = array<i32: 0>} : vector<256x1xi32>
      %c256_i32 = arith.constant 256 : i32
      %18 = arith.muli %arg0, %c256_i32 : i32
      %19 = vector.broadcast %18 : i32 to vector<256x1xi32>
      %20 = arith.addi %17, %19 : vector<256x1xi32>
      %c2048_i32 = arith.constant 2048 : i32
      %21 = vector.broadcast %c2048_i32 : i32 to vector<256x1xi32>
      %22 = arith.cmpi slt, %20, %21 : vector<256x1xi32>
      %23 = arith.extui %22 : vector<256x1xi1> to vector<256x1xi32>
      %24 = arith.sitofp %23 : vector<256x1xi32> to vector<256x1xf32>
      %25 = vector.broadcast %24 : vector<256x1xf32> to vector<256x128xf32>
      %26 = arith.mulf %15, %25 : vector<256x128xf32>
      %cst_16 = arith.constant dense<0.000000e+00> : vector<128xf32>
      %27 = vector.multi_reduction <add>, %26, %cst_16 [0] : vector<256x128xf32> to vector<128xf32>
      %28 = vector.shape_cast %27 : vector<128xf32> to vector<1x128xf32>
      %29 = arith.mulf %26, %26 : vector<256x128xf32>
      %cst_17 = arith.constant dense<0.000000e+00> : vector<128xf32>
      %30 = vector.multi_reduction <add>, %29, %cst_17 [0] : vector<256x128xf32> to vector<128xf32>
      %31 = vector.shape_cast %30 : vector<128xf32> to vector<1x128xf32>
      %32 = tpu.iota {dimensions = array<i32: 0>} : vector<8x1xi32>
      %c0_i32_18 = arith.constant 0 : i32
      %33 = vector.broadcast %c0_i32_18 : i32 to vector<8x1xi32>
      %34 = arith.cmpi eq, %32, %33 : vector<8x1xi32>
      %cst_19 = arith.constant 0.000000e+00 : f32
      %35 = vector.shape_cast %34 : vector<8x1xi1> to vector<8x1xi1>
      %36 = vector.broadcast %35 : vector<8x1xi1> to vector<8x128xi1>
      %37 = vector.shape_cast %28 : vector<1x128xf32> to vector<1x128xf32>
      %38 = vector.broadcast %37 : vector<1x128xf32> to vector<8x128xf32>
      %39 = vector.broadcast %cst_19 : f32 to vector<8x128xf32>
      %40 = arith.select %36, %38, %39 : vector<8x128xi1>, vector<8x128xf32>
      %c1_i32 = arith.constant 1 : i32
      %41 = vector.broadcast %c1_i32 : i32 to vector<8x1xi32>
      %42 = arith.cmpi eq, %32, %41 : vector<8x1xi32>
      %cst_20 = arith.constant 0.000000e+00 : f32
      %43 = vector.shape_cast %42 : vector<8x1xi1> to vector<8x1xi1>
      %44 = vector.broadcast %43 : vector<8x1xi1> to vector<8x128xi1>
      %45 = vector.shape_cast %31 : vector<1x128xf32> to vector<1x128xf32>
      %46 = vector.broadcast %45 : vector<1x128xf32> to vector<8x128xf32>
      %47 = vector.broadcast %cst_20 : f32 to vector<8x128xf32>
      %48 = arith.select %44, %46, %47 : vector<8x128xi1>, vector<8x128xf32>
      %49 = arith.addf %40, %48 : vector<8x128xf32>
      %c0_21 = arith.constant 0 : index
      %c0_22 = arith.constant 0 : index
      %50 = vector.load %arg6[%c0_21, %c0_22] : memref<8x128xf32, #tpu.memory_space<vmem>>, vector<8x128xf32>
      tpu.vector_store %arg6[%c0_21, %c0_22], %49 {strides = array<i32>} : memref<8x128xf32, #tpu.memory_space<vmem>>, vector<8x128xf32>,
    } else {
    }
    return
  }
  func.func @transform_0(%arg0: i32, %arg1: i32) -> (i32, i32) {
    %c0_i32 = arith.constant 0 : i32
    return %arg0, %arg1 : i32, i32
  }
  func.func @transform_1(%arg0: i32, %arg1: i32) -> (i32, i32) {
    %c0_i32 = arith.constant 0 : i32
    %c0_i32_0 = arith.constant 0 : i32
    return %arg1, %c0_i32 : i32, i32
  }
  func.func @transform_2(%arg0: i32, %arg1: i32) -> (i32, i32) {
    %c0_i32 = arith.constant 0 : i32
    %c0_i32_0 = arith.constant 0 : i32
    %c0_i32_1 = arith.constant 0 : i32
    return %c0_i32, %c0_i32_0 : i32, i32
  }
  func.func @transform_3(%arg0: i32, %arg1: i32) -> (i32, i32) {
    %c0_i32 = arith.constant 0 : i32
    %c0_i32_0 = arith.constant 0 : i32
    return %arg0, %c0_i32 : i32, i32
  }
  func.func @transform_4(%arg0: i32, %arg1: i32) -> (i32, i32) {
    %c0_i32 = arith.constant 0 : i32
    %c0_i32_0 = arith.constant 0 : i32
    return %arg0, %c0_i32 : i32, i32
  }
}

</mosaic_0001>

<bundles_post_ra>
// kernel: tpu_custom_call.1
= control target key start
LH: loop header
LB: loop body
LE: loop exit
PB: predicated region body
PF: predicated region fallthrough
CT: control target
= control target key end

     0   :  { %s2637_s0 = inlined_call_operand.hbm [shape: bf16[2048,256], index: 0, kind: input, shape index: {}]   ;;  %s2638_s1 = inlined_call_operand.hbm [shape: bf16[256,128], index: 1, kind: input, shape index: {}]   ;;  %s2639_s2 = inlined_call_operand.vmem [shape: f32[1,128], index: 2, kind: input, shape index: {}]   ;;  %s2640_s3 = inlined_call_operand.hbm [shape: f32[2048,128], index: 3, kind: output, shape index: {0}]   ;;  %s2641_s4 = inlined_call_operand.hbm [shape: f32[64,128], index: 4, kind: output, shape index: {1}]  }
   0x1   :  { %2643 = sst [smem:[#allocation16_spill]] %s2638_s1 }
   0x2   :  { %10 = vsyncpa [#allocation4], 0 }
   0x3   :  { %12 = vsyncpa [#allocation4 + $0x1], 0 }
   0x4   :  { %13 = vsyncpa [#allocation7], 0 }
   0x5   :  { %14 = vsyncpa [#allocation5], 0 }
   0x6   :  { %16 = vsyncpa [#allocation5 + $0x1], 0 }
   0x7   :  { %17 = vsyncpa [#allocation10], 0 }
   0x8   :  { %19 = vsyncpa [#allocation10 + $0x1], 0  ;;  %s2095_s15 = smov 0   ;;  %s2097_s16 = smov 0  }
   0x9   :  { %s2099_s17 = smov 0   ;;  %s2101_s18 = smov 0  }
   0xa   :  { %s2103_s19 = smov 0   ;;  %s2105_s20 = smov 0  }
   0xb LB: > { %s1483_s21 = sadd.s32 4294967295, %s2060_s20   ;;  %s1484_s22 = sadd.s32 4294967294, %s2060_s20   ;;  %s2060_s20 = sphi %s2105_s20, %s25_s20   ;;  %s2056_s19 = sphi %s2103_s19, %s2658_s19   ;;  %s2052_s18 = sphi %s2101_s18, %s2657_s18   ;;  %s2048_s17 = sphi %s2099_s17, %s2656_s17   ;;  %s2044_s16 = sphi %s2097_s16, %s2655_s16   ;;  %s2040_s15 = sphi %s2095_s15, %s2654_s15  }
   0xc   : > { %p59_p0 = scmp.ne.s32.totalorder %s2044_s16, %s2040_s15  ;;  %p2129_p1 = scmp.eq.s32.totalorder %s1483_s21, 0 }
   0xd   : > { %p2133_p2 = scmp.eq.s32.totalorder %s1483_s21, 7  ;;  %p136_p3 = scmp.eq.s32.totalorder %s1484_s22, 7 }
   0xe   : > { %p2139_p4 = por %p2129_p1, %p59_p0  ;;  %p1485_p5 = scmp.ge.s32.totalorder %s2060_s20, 1 }
   0xf   : > { %p2144_p6 = por %p136_p3, %p59_p0  ;;  %p169_p7 = scmp.lt.s32.totalorder %s2060_s20, 9 }
  0x10   : > { %s2648_s1 = sld [smem:[#allocation16_spill]]  ;;  %s2062_s5 = smov [#allocation6]  }
  0x11   : > { %p2152_p8 = pnand %p1485_p5, %p169_p7  ;;  %s185_s6 = sshll.u32 %s2062_s5, 4  ;;  %s186_s6 = int_to_ptr.vmem [resolvable:$true] %s185_s6 }
  0x12   : > { %s2063_s7 = smov 64   ;;  %s2064_s8 = smov 4  }
  0x13   : > { %p1806_p9 = pneg %p2152_p8  ;;  %s37_s9 = sadd.s32 1, %s2056_s19 }
  0x14   : > { %p39_p11 = scmp.ge.s32.totalorder %s37_s9, 8  ;;  %s46_s10 = sadd.s32 1, %s2048_s17 }
  0x15   : > { %p1807_p10 = pnand %p1806_p9, %p2129_p1  ;;  %p53_p12 = scmp.ne.s32.totalorder %s2048_s17, %s2044_s16 }
  0x16   : > { %s183_s29 = sshll.u32 %s2648_s1, 4  ;;  %p54_p13 = scmp.eq.s32.totalorder %s2060_s20, 0  ;;  %s184_s29 = int_to_ptr.hbm [resolvable:$true] %s183_s29 }
  0x17   : > { %1809 = dma.hbm_to_vmem [thread:$0]  (!%p1807_p10), %s184_s29, 2048, %s186_s6, [#allocation7], %s2063_s7, %s2063_s7, %s2064_s8  }
  0x18   : > { %s2660_s9 = smov (%p39_p11, %s37_s9), 0  ;;  %p2167_p0 = por %p54_p13, %p53_p12 }
  0x19   : > { %2650 = sst [smem:[#allocation15_spill]] %s2660_s9  ;;  %p2173_p3 = por %p2133_p2, %p53_p12 }
  0x1a   : > { %s41_s13 = ssub.s32 %s2056_s19, %s2660_s9  ;;  %p1822_p5 = scmp.lt.s32.totalorder %s2060_s20, 8 }
  0x1b   : > { %p44_p7 = scmp.eq.s32.totalorder %s41_s13, 0  ;;  %s202_s14 = sand.u32 1, %s2048_s17  }
  0x1c   : > { %s1488_s21 = sshll.u32 %s202_s14, 8  ;;  %s1730_s27 = sshll.u32 %s2056_s19, 8 }
  0x1d   : > { %s2182_s22 = scalar_select %p44_p7, %s2048_s17, %s46_s10  }
  0x1e   : > { %s214_s5 = scalar_lea.hbm %s2637_s0, %s1730_s27  ;;  %s206_s6 = scalar_lea.vmem [#allocation3], %s1488_s21 }
  0x1f   : > { %s217_s7 = sshll.u32 %s206_s6, 4  ;;  %s215_s24 = sshll.u32 %s214_s5, 4  ;;  %s218_s7 = int_to_ptr.vmem [resolvable:$true] %s217_s7  ;;  %s216_s24 = int_to_ptr.hbm [resolvable:$true] %s215_s24 }
  0x20   : > { %p1811_p2 = pnand %p1822_p5, %p2167_p0  ;;  %s203_s8 = scalar_lea.sflag [#allocation4], %s202_s14 }
  0x21   : > { %s2065_s1 = smov 128   ;;  %s2066_s9 = smov 8  }
  0x22   : > { %1813 = dma.hbm_to_vmem [thread:$0]  (!%p1811_p2), %s216_s24, 4096, %s218_s7, %s203_s8, %s2065_s1, %s2065_s1, %s2066_s9  }
  0x23   : > { %229 = sbr.rel (%p2152_p8) target bundleno = 383 (0x17f), region = 32  ;;  %s2193_s10 = sand.u32 (!%p2152_p8), 1, %s2044_s16  }
  0x24   : > { %s1493_s13 = sshll.u32 (!%p2152_p8), %s2193_s10, 8  ;;  %s232_s21 = scalar_lea.sflag (!%p2152_p8), [#allocation4], %s2193_s10 }
  0x25   : > { %s2199_s27 = scalar_lea.vmem (!%p2152_p8), [#allocation3], %s1493_s13 }
  0x28   : > { %2023 = dma.done.wait (%p2139_p4), %s232_s21, 4096  }
  0x29   : > { %2025 = vsyncadd (%p2139_p4), %s232_s21, 4294963200 }
  0x2a   : > { %2027 = dma.done.wait (%p2129_p1), [#allocation7], 2048  }
  0x2b   : > { %2029 = vsyncadd (%p2129_p1), [#allocation7], 4294965248  ;;  %v1770_v0 = vld [vmem:[#allocation6 + $0x38] sm:$0xff]  ;;  %v1769_v2 = vld [vmem:[#allocation6 + $0x30] sm:$0xff]  ;;  %s1689_s1 = sshll.u32 %s2052_s18, 8  ;;  %s2292_s30 = scalar_lea.vmem [#allocation8], %s1493_s13 }
  0x2c   : > { %v1778_v1 = vld [vmem:[#allocation6 + $0x78] sm:$0xff]  ;;  %663 = vmatpush.bf16.msra.mxu0 %v1770_v0  ;;  %v1777_v3 = vld [vmem:[#allocation6 + $0x70] sm:$0xff]  ;;  %1780 = vmatpush.bf16.msra.mxu2 %v1770_v0  ;;  %v1768_v4 = vld [vmem:[#allocation6 + $0x28] sm:$0xff]  ;;  %s2512_s14 = scalar_lea.hbm %s2640_s3, %s1689_s1  ;;  %s1337_s28 = sshll.u32 %s2292_s30, 4  ;;  %s2534_s28 = int_to_ptr.vmem [resolvable:$true] %s1337_s28 }
  0x2d   : > { %752 = vmatpush.bf16.msra.mxu1 %v1778_v1  ;;  %1788 = vmatpush.bf16.msra.mxu3 %v1778_v1  ;;  %v1776_v5 = vld [vmem:[#allocation6 + $0x68] sm:$0xff]  ;;  %v1767_v6 = vld [vmem:[#allocation6 + $0x20] sm:$0xff]  ;;  %v1766_v8 = vld [vmem:[#allocation6 + $0x18] sm:$0xff]  ;;  %s1339_s29 = sshll.u32 %s2512_s14, 4  ;;  %s1320_s5 = scalar_lea.sflag [#allocation5], %s2193_s10  ;;  %s2536_s29 = int_to_ptr.hbm [resolvable:$true] %s1339_s29 }
  0x2e   : > { %v1775_v7 = vld [vmem:[#allocation6 + $0x60] sm:$0xff]  ;;  %v1774_v9 = vld [vmem:[#allocation6 + $0x58] sm:$0xff]  ;;  %v1765_v10 = vld [vmem:[#allocation6 + $0x10] sm:$0xff]  ;;  %s1956_s6 = sshra.s32 %s2536_s29, 4  ;;  %s1962_s13 = scalar_lea.hbm %s2640_s3, 2048  ;;  %s1957_s6 = int_to_ptr.hbm [resolvable:$true] %s1956_s6 }
  0x2f   : > { %v1773_v11 = vld [vmem:[#allocation6 + $0x50] sm:$0xff]  ;;  %v1764_v12 = vld [vmem:[#allocation6 + $0x8] sm:$0xff]  ;;  %v1763_v14 = vld [vmem:[#allocation6] sm:$0xff]  ;;  %s1958_s7 = scalar_lea.hbm %s1957_s6, 256  ;;  %p1963_p9 = scmp.lt.s32.totalorder %s1957_s6, %s2640_s3 }
  0x30   : > { %664 = vmatpush.bf16.msra.mxu0 %v1769_v2  ;;  %1781 = vmatpush.bf16.msra.mxu2 %v1769_v2  ;;  %v1772_v13 = vld [vmem:[#allocation6 + $0x48] sm:$0xff]  ;;  %v1771_v15 = vld [vmem:[#allocation6 + $0x40] sm:$0xff]  ;;  %v1507_v28 = vld [vmem:[%s2199_s27 + $0x10] sm:$0xf]  ;;  %p1959_p1 = scmp.ne.s32.totalorder %s1957_s6, %s1958_s7  ;;  %p1964_p10 = scmp.lt.s32.totalorder %s1962_s13, %s1958_s7 }
  0x31   : > { %753 = vmatpush.bf16.msra.mxu1 %v1777_v3  ;;  %1789 = vmatpush.bf16.msra.mxu3 %v1777_v3  ;;  %v1499_v16 = vld [vmem:[%s2199_s27] sm:$0xf]  ;;  %v1732_v17 = vld [vmem:[%s2199_s27 + $0x4] sm:$0xf0]  ;;  %v1731_v18 = vld [vmem:[%s2199_s27 + $0x4] sm:$0xf] }
  0x32   : > { %v1501_v19 = vld [vmem:[%s2199_s27 + $0x8] sm:$0xf0]  ;;  %v1563_v20 = vld [vmem:[%s2199_s27 + $0x80] sm:$0xf]  ;;  %v1748_v21 = vld [vmem:[%s2199_s27 + $0x84] sm:$0xf0]  ;;  %v1500_v24 = vor.u32 %v1732_v17, %v1499_v16  ;;  %p1960_p4 = pnand %p1959_p1, %p2173_p3  ;;  %p1965_p11 = por %p1964_p10, %p1963_p9 }
  0x33   : > { %v1747_v22 = vld [vmem:[%s2199_s27 + $0x84] sm:$0xf]  ;;  %v1565_v23 = vld [vmem:[%s2199_s27 + $0x88] sm:$0xf0]  ;;  %v1504_v25 = vor.u32 %v1731_v18, %v1501_v19  ;;  %v1564_v26 = vor.u32 %v1748_v21, %v1563_v20  ;;  %v1734_v29 = vld [vmem:[%s2199_s27 + $0x14] sm:$0xf0] }
  0x34   : > { %665 = vmatpush.bf16.msra.mxu0 %v1768_v4  ;;  %1782 = vmatpush.bf16.msra.mxu2 %v1768_v4  ;;  %v1568_v27 = vor.u32 %v1747_v22, %v1565_v23  ;;  %v1733_v30 = vld [vmem:[%s2199_s27 + $0x14] sm:$0xf]  ;;  %v1509_v31 = vld [vmem:[%s2199_s27 + $0x18] sm:$0xf0]  ;;  %v1571_v32 = vld [vmem:[%s2199_s27 + $0x90] sm:$0xf]  ;;  %v1508_v36 = vor.u32 %v1734_v29, %v1507_v28  ;;  %p1961_p8 = pneg %p1960_p4 }
  0x35   : > { %754 = vmatpush.bf16.msra.mxu1 %v1776_v5  ;;  %1790 = vmatpush.bf16.msra.mxu3 %v1776_v5  ;;  %v1750_v33 = vld [vmem:[%s2199_s27 + $0x94] sm:$0xf0]  ;;  %v1749_v34 = vld [vmem:[%s2199_s27 + $0x94] sm:$0xf]  ;;  %v1573_v35 = vld [vmem:[%s2199_s27 + $0x98] sm:$0xf0]  ;;  %v1512_v37 = vor.u32 %v1733_v30, %v1509_v31 }
  0x36   : > { %v1572_v38 = vor.u32 %v1750_v33, %v1571_v32  ;;  %v1576_v39 = vor.u32 %v1749_v34, %v1573_v35  ;;  %v1515_v40 = vld [vmem:[%s2199_s27 + $0x20] sm:$0xf]  ;;  %v1736_v41 = vld [vmem:[%s2199_s27 + $0x24] sm:$0xf0]  ;;  %v1735_v42 = vld [vmem:[%s2199_s27 + $0x24] sm:$0xf]  ;;  %p1966_p12 = pnand %p1965_p11, %p1961_p8 }
  0x37   : > { %v1517_v43 = vld [vmem:[%s2199_s27 + $0x28] sm:$0xf0]  ;;  %v1579_v44 = vld [vmem:[%s2199_s27 + $0xa0] sm:$0xf]  ;;  %v1752_v45 = vld [vmem:[%s2199_s27 + $0xa4] sm:$0xf0]  ;;  %v1516_v48 = vor.u32 %v1736_v41, %v1515_v40 }
  0x38   : > { %666 = vmatpush.bf16.msra.mxu0 %v1767_v6  ;;  %1783 = vmatpush.bf16.msra.mxu2 %v1767_v6  ;;  %v1751_v46 = vld [vmem:[%s2199_s27 + $0xa4] sm:$0xf]  ;;  %v1581_v47 = vld [vmem:[%s2199_s27 + $0xa8] sm:$0xf0]  ;;  %v1520_v49 = vor.u32 %v1735_v42, %v1517_v43  ;;  %v1580_v50 = vor.u32 %v1752_v45, %v1579_v44  ;;  %v1523_v52 = vld [vmem:[%s2199_s27 + $0x30] sm:$0xf] }
  0x39   : > { %755 = vmatpush.bf16.msra.mxu1 %v1775_v7  ;;  %1791 = vmatpush.bf16.msra.mxu3 %v1775_v7  ;;  %v1584_v51 = vor.u32 %v1751_v46, %v1581_v47  ;;  %v1738_v53 = vld [vmem:[%s2199_s27 + $0x34] sm:$0xf0]  ;;  %v1737_v54 = vld [vmem:[%s2199_s27 + $0x34] sm:$0xf]  ;;  %v1525_v55 = vld [vmem:[%s2199_s27 + $0x38] sm:$0xf0] }
  0x3a   : > { %v1587_v56 = vld [vmem:[%s2199_s27 + $0xb0] sm:$0xf]  ;;  %v1754_v57 = vld [vmem:[%s2199_s27 + $0xb4] sm:$0xf0]  ;;  %v1753_v58 = vld [vmem:[%s2199_s27 + $0xb4] sm:$0xf]  ;;  %v1524_v60 = vor.u32 %v1738_v53, %v1523_v52  ;;  %v1528_v61 = vor.u32 %v1737_v54, %v1525_v55 }
  0x3b   : > { %v1589_v59 = vld [vmem:[%s2199_s27 + $0xb8] sm:$0xf0]  ;;  %v1588_v62 = vor.u32 %v1754_v57, %v1587_v56  ;;  %v1531_v0 = vld [vmem:[%s2199_s27 + $0x40] sm:$0xf]  ;;  %v1740_v1 = vld [vmem:[%s2199_s27 + $0x44] sm:$0xf0] }
  0x3c   : > { %667 = vmatpush.bf16.msra.mxu0 %v1766_v8  ;;  %1784 = vmatpush.bf16.msra.mxu2 %v1766_v8  ;;  %v1592_v63 = vor.u32 %v1753_v58, %v1589_v59  ;;  %v1739_v2 = vld [vmem:[%s2199_s27 + $0x44] sm:$0xf]  ;;  %v1533_v3 = vld [vmem:[%s2199_s27 + $0x48] sm:$0xf0]  ;;  %v1595_v4 = vld [vmem:[%s2199_s27 + $0xc0] sm:$0xf]  ;;  %v1532_v8 = vor.u32 %v1740_v1, %v1531_v0 }
  0x3d   : > { %756 = vmatpush.bf16.msra.mxu1 %v1774_v9  ;;  %1792 = vmatpush.bf16.msra.mxu3 %v1774_v9  ;;  %v1756_v5 = vld [vmem:[%s2199_s27 + $0xc4] sm:$0xf0]  ;;  %v1755_v6 = vld [vmem:[%s2199_s27 + $0xc4] sm:$0xf]  ;;  %v1597_v7 = vld [vmem:[%s2199_s27 + $0xc8] sm:$0xf0]  ;;  %v1536_v9 = vor.u32 %v1739_v2, %v1533_v3 }
  0x3e   : > { %v1603_v16 = vld [vmem:[%s2199_s27 + $0xd0] sm:$0xf]  ;;  %v1758_v17 = vld [vmem:[%s2199_s27 + $0xd4] sm:$0xf0]  ;;  %v1757_v18 = vld [vmem:[%s2199_s27 + $0xd4] sm:$0xf] }
  0x3f   : > { %v1605_v19 = vld [vmem:[%s2199_s27 + $0xd8] sm:$0xf0]  ;;  %v1604_v22 = vor.u32 %v1758_v17, %v1603_v16  ;;  %v1611_v28 = vld [vmem:[%s2199_s27 + $0xe0] sm:$0xf]  ;;  %v1760_v29 = vld [vmem:[%s2199_s27 + $0xe4] sm:$0xf0] }
  0x40   : > { %668 = vmatpush.bf16.msra.mxu0 %v1765_v10  ;;  %1785 = vmatpush.bf16.msra.mxu2 %v1765_v10  ;;  %v1596_v10 = vor.u32 %v1756_v5, %v1595_v4  ;;  %v1608_v23 = vor.u32 %v1757_v18, %v1605_v19  ;;  %v1759_v30 = vld [vmem:[%s2199_s27 + $0xe4] sm:$0xf]  ;;  %v1613_v31 = vld [vmem:[%s2199_s27 + $0xe8] sm:$0xf0]  ;;  %v1612_v34 = vor.u32 %v1760_v29, %v1611_v28  ;;  %v1619_v40 = vld [vmem:[%s2199_s27 + $0xf0] sm:$0xf] }
  0x41   : > { %757 = vmatpush.bf16.msra.mxu1 %v1773_v11  ;;  %1793 = vmatpush.bf16.msra.mxu3 %v1773_v11  ;;  %v1600_v11 = vor.u32 %v1755_v6, %v1597_v7  ;;  %v1616_v35 = vor.u32 %v1759_v30, %v1613_v31  ;;  %v1762_v41 = vld [vmem:[%s2199_s27 + $0xf4] sm:$0xf0]  ;;  %v1761_v42 = vld [vmem:[%s2199_s27 + $0xf4] sm:$0xf]  ;;  %v1621_v43 = vld [vmem:[%s2199_s27 + $0xf8] sm:$0xf0] }
  0x42   : > { %v1620_v46 = vor.u32 %v1762_v41, %v1619_v40  ;;  %v1624_v47 = vor.u32 %v1761_v42, %v1621_v43 }
  0x44   : > { %669 = vmatpush.bf16.msra.mxu0 %v1764_v12  ;;  %1786 = vmatpush.bf16.msra.mxu2 %v1764_v12  ;;  %v1539_v12 = vld [vmem:[%s2199_s27 + $0x50] sm:$0xf] }
  0x45   : > { %758 = vmatpush.bf16.msra.mxu1 %v1772_v13  ;;  %1794 = vmatpush.bf16.msra.mxu3 %v1772_v13  ;;  %v1742_v13 = vld [vmem:[%s2199_s27 + $0x54] sm:$0xf0] }
  0x46   : > { %v1540_v20 = vor.u32 %v1742_v13, %v1539_v12 }
  0x48   : > { %670 = vmatpush.bf16.msra.mxu0 %v1763_v14  ;;  %1787 = vmatpush.bf16.msra.mxu2 %v1763_v14  ;;  %v1741_v14 = vld [vmem:[%s2199_s27 + $0x54] sm:$0xf] }
  0x49   : > { %759 = vmatpush.bf16.msra.mxu1 %v1771_v15  ;;  %1795 = vmatpush.bf16.msra.mxu3 %v1771_v15  ;;  %v1541_v15 = vld [vmem:[%s2199_s27 + $0x58] sm:$0xf0] }
  0x4a   : > { %v1544_v21 = vor.u32 %v1741_v14, %v1541_v15 }
  0x4b   : > { %671 = vmatmul.bf16.vlgmr.msra.gmra.mxu0 %v1500_v24  ;;  %711 = vmatmul.bf16.vlgmr.msra.gmra.mxu2 %v1564_v26  ;;  %v1547_v24 = vld [vmem:[%s2199_s27 + $0x60] sm:$0xf]  ;;  %v1743_v26 = vld [vmem:[%s2199_s27 + $0x64] sm:$0xf] }
  0x4c   : > { %760 = vmatmul.bf16.vlgmr.msra.gmra.mxu1 %v1504_v25  ;;  %800 = vmatmul.bf16.vlgmr.msra.gmra.mxu3 %v1568_v27  ;;  %v1744_v25 = vld [vmem:[%s2199_s27 + $0x64] sm:$0xf0]  ;;  %v1549_v27 = vld [vmem:[%s2199_s27 + $0x68] sm:$0xf0] }
  0x4d   : > { %v1548_v32 = vor.u32 %v1744_v25, %v1547_v24  ;;  %v1552_v33 = vor.u32 %v1743_v26, %v1549_v27 }
  0x5b   : > { %676 = vmatmul.bf16.gmra.mxu0 %v1508_v36  ;;  %716 = vmatmul.bf16.gmra.mxu2 %v1572_v38  ;;  %v1555_v36 = vld [vmem:[%s2199_s27 + $0x70] sm:$0xf]  ;;  %v1745_v38 = vld [vmem:[%s2199_s27 + $0x74] sm:$0xf] }
  0x5c   : > { %765 = vmatmul.bf16.gmra.mxu1 %v1512_v37  ;;  %805 = vmatmul.bf16.gmra.mxu3 %v1576_v39  ;;  %v1746_v37 = vld [vmem:[%s2199_s27 + $0x74] sm:$0xf0]  ;;  %v1557_v39 = vld [vmem:[%s2199_s27 + $0x78] sm:$0xf0] }
  0x5d   : > { %v1556_v44 = vor.u32 %v1746_v37, %v1555_v36  ;;  %v1560_v45 = vor.u32 %v1745_v38, %v1557_v39 }
  0x6b   : > { %681 = vmatmul.bf16.gmra.mxu0 %v1516_v48  ;;  %721 = vmatmul.bf16.gmra.mxu2 %v1580_v50  ;;  %v1008_v48 = vlaneseq  ;;  %v2278_v50 = vstv %s1689_s1 }
  0x6c   : > { %770 = vmatmul.bf16.gmra.mxu1 %v1520_v49  ;;  %810 = vmatmul.bf16.gmra.mxu3 %v1584_v51  ;;  %v2283_v51 = vld [vmem:[%s2639_s2] ss:$0 sm:$0xff] }
  0x6d   : > { %v2274_v49 = vshrl.u32 %v1008_v48, 7 }
  0x6f   : > { %v1010_v52 = vadd.s32 8, %v2274_v49  ;;  %v1043_v56 = vadd.s32 %v2278_v50, %v2274_v49  ;;  %v1011_v59 = vadd.s32 16, %v2274_v49  ;;  %v1012_v13 = vadd.s32 24, %v2274_v49 }
  0x70   : > { %v1013_v28 = vadd.s32 32, %v2274_v49 }
  0x71   : > { %v1044_v58 = vadd.s32 %v2278_v50, %v1010_v52  ;;  %vm1075_vm0 = vcmp.lt.s32.totalorder %v1043_v56, 2048  ;;  %v1045_v5 = vadd.s32 %v2278_v50, %v1011_v59  ;;  %v1046_v24 = vadd.s32 %v2278_v50, %v1012_v13 }
  0x72   : > { %v1047_v39 = vadd.s32 %v2278_v50, %v1013_v28 }
  0x73   : > { %vm1076_vm1 = vcmp.lt.s32.totalorder %v1044_v58, 2048  ;;  %vm1077_vm2 = vcmp.lt.s32.totalorder %v1045_v5, 2048  ;;  %vm1078_vm3 = vcmp.lt.s32.totalorder %v1046_v24, 2048 }
  0x74   : > { %vm1079_vm4 = vcmp.lt.s32.totalorder %v1047_v39, 2048 }
  0x7b   : > { %686 = vmatmul.bf16.gmra.mxu0 %v1524_v60  ;;  %726 = vmatmul.bf16.gmra.mxu2 %v1588_v62  ;;  %v2067_v62 = vmov 0.0  }
  0x7c   : > { %775 = vmatmul.bf16.gmra.mxu1 %v1528_v61  ;;  %815 = vmatmul.bf16.gmra.mxu3 %v1592_v63  ;;  %v1690_v63 = vsel %vm1075_vm0, 1.0, %v2067_v62  ;;  %v1691_v4 = vsel %vm1076_vm1, 1.0, %v2067_v62  ;;  %v1693_v36 = vsel %vm1078_vm3, 1.0, %v2067_v62 }
  0x8b   : > { %691 = vmatmul.bf16.gmra.mxu0 %v1532_v8  ;;  %731 = vmatmul.bf16.gmra.mxu2 %v1596_v10 }
  0x8c   : > { %780 = vmatmul.bf16.gmra.mxu1 %v1536_v9  ;;  %820 = vmatmul.bf16.gmra.mxu3 %v1600_v11 }
  0x9b   : > { %696 = vmatmul.bf16.gmra.mxu0 %v1540_v20  ;;  %736 = vmatmul.bf16.gmra.mxu2 %v1604_v22 }
  0x9c   : > { %785 = vmatmul.bf16.gmra.mxu1 %v1544_v21  ;;  %825 = vmatmul.bf16.gmra.mxu3 %v1608_v23  ;;  %v1692_v21 = vsel %vm1077_vm2, 1.0, %v2067_v62 }
  0xab   : > { %701 = vmatmul.bf16.gmra.mxu0 %v1548_v32  ;;  %741 = vmatmul.bf16.gmra.mxu2 %v1612_v34 }
  0xac   : > { %790 = vmatmul.bf16.gmra.mxu1 %v1552_v33  ;;  %830 = vmatmul.bf16.gmra.mxu3 %v1616_v35 }
  0xbb   : > { %706 = vmatmul.bf16.gmra.mxu0 %v1556_v44  ;;  %746 = vmatmul.bf16.gmra.mxu2 %v1620_v46 }
  0xbc   : > { %795 = vmatmul.bf16.gmra.mxu1 %v1560_v45  ;;  %835 = vmatmul.bf16.gmra.mxu3 %v1624_v47 }
  0xc8   : > { %v672_v53 = vpop.f32.mrf.mxu0 }
  0xc9   : > { %v761_v54 = vpop.f32.mrf.mxu1 }
  0xca   : > { %v762_v55 = vadd.f32 %v761_v54, %v672_v53  ;;  %v1694_v53 = vsel %vm1079_vm4, 1.0, %v2067_v62 }
  0xcc   : > { %v944_v57 = vadd.f32 %v2283_v51, %v762_v55 }
  0xce   : > { %976 = vst [vmem:[%s2292_s30] sm:$0xff] %v944_v57  ;;  %v712_v60 = vpop.f32.mrf.mxu2  ;;  %v1171_v7 = vmul.f32 %v1690_v63, %v944_v57 }
  0xcf   : > { %v801_v61 = vpop.f32.mrf.mxu3 }
  0xd0   : > { %v674_v0 = vpop.f32.mrf.mxu0  ;;  %v802_v2 = vadd.f32 %v801_v61, %v712_v60  ;;  %v1240_v10 = vmul.f32 %v1171_v7, %v1171_v7 }
  0xd1   : > { %v763_v1 = vpop.f32.mrf.mxu1 }
  0xd2   : > { %v764_v3 = vadd.f32 %v763_v1, %v674_v0  ;;  %v2300_v6 = vadd.f32 %v2283_v51, %v802_v2 }
  0xd4   : > { %v945_v8 = vadd.f32 %v2283_v51, %v764_v3  ;;  %992 = vst [vmem:[%s2292_s30 + $0x80] sm:$0xff] %v2300_v6 }
  0xd6   : > { %977 = vst [vmem:[%s2292_s30 + $0x8] sm:$0xff] %v945_v8  ;;  %v1172_v9 = vmul.f32 %v1691_v4, %v945_v8  ;;  %v714_v14 = vpop.f32.mrf.mxu2 }
  0xd7   : > { %v803_v15 = vpop.f32.mrf.mxu3 }
  0xd8   : > { %v1203_v11 = vadd.f32 %v1172_v9, %v1171_v7  ;;  %v1241_v12 = vmul.f32 %v1172_v9, %v1172_v9  ;;  %v677_v16 = vpop.f32.mrf.mxu0  ;;  %v804_v18 = vadd.f32 %v803_v15, %v714_v14 }
  0xd9   : > { %v766_v17 = vpop.f32.mrf.mxu1 }
  0xda   : > { %v1272_v19 = vadd.f32 %v1241_v12, %v1240_v10  ;;  %v767_v20 = vadd.f32 %v766_v17, %v677_v16  ;;  %v2309_v22 = vadd.f32 %v2283_v51, %v804_v18 }
  0xdc   : > { %v946_v23 = vadd.f32 %v2283_v51, %v767_v20  ;;  %993 = vst [vmem:[%s2292_s30 + $0x88] sm:$0xff] %v2309_v22 }
  0xde   : > { %978 = vst [vmem:[%s2292_s30 + $0x10] sm:$0xff] %v946_v23  ;;  %v1173_v25 = vmul.f32 %v1692_v21, %v946_v23  ;;  %v717_v29 = vpop.f32.mrf.mxu2 }
  0xdf   : > { %v806_v30 = vpop.f32.mrf.mxu3 }
  0xe0   : > { %v1204_v26 = vadd.f32 %v1203_v11, %v1173_v25  ;;  %v1242_v27 = vmul.f32 %v1173_v25, %v1173_v25  ;;  %v679_v31 = vpop.f32.mrf.mxu0  ;;  %v807_v33 = vadd.f32 %v806_v30, %v717_v29 }
  0xe1   : > { %v768_v32 = vpop.f32.mrf.mxu1 }
  0xe2   : > { %v1273_v34 = vadd.f32 %v1272_v19, %v1242_v27  ;;  %v769_v35 = vadd.f32 %v768_v32, %v679_v31  ;;  %v2319_v37 = vadd.f32 %v2283_v51, %v807_v33 }
  0xe4   : > { %v947_v38 = vadd.f32 %v2283_v51, %v769_v35  ;;  %994 = vst [vmem:[%s2292_s30 + $0x90] sm:$0xff] %v2319_v37 }
  0xe6   : > { %979 = vst [vmem:[%s2292_s30 + $0x18] sm:$0xff] %v947_v38  ;;  %v1174_v40 = vmul.f32 %v1693_v36, %v947_v38  ;;  %v719_v43 = vpop.f32.mrf.mxu2 }
  0xe7   : > { %v808_v44 = vpop.f32.mrf.mxu3 }
  0xe8   : > { %v1205_v41 = vadd.f32 %v1204_v26, %v1174_v40  ;;  %v1243_v42 = vmul.f32 %v1174_v40, %v1174_v40  ;;  %v682_v45 = vpop.f32.mrf.mxu0  ;;  %v809_v47 = vadd.f32 %v808_v44, %v719_v43 }
  0xe9   : > { %v771_v46 = vpop.f32.mrf.mxu1 }
  0xea   : > { %v1274_v48 = vadd.f32 %v1273_v34, %v1243_v42  ;;  %v772_v52 = vadd.f32 %v771_v46, %v682_v45  ;;  %v2328_v54 = vadd.f32 %v2283_v51, %v809_v47 }
  0xec   : > { %v948_v55 = vadd.f32 %v2283_v51, %v772_v52  ;;  %995 = vst [vmem:[%s2292_s30 + $0x98] sm:$0xff] %v2328_v54 }
  0xee   : > { %980 = vst [vmem:[%s2292_s30 + $0x20] sm:$0xff] %v948_v55  ;;  %v1175_v56 = vmul.f32 %v1694_v53, %v948_v55  ;;  %v722_v59 = vpop.f32.mrf.mxu2  ;;  %v1015_v55 = vadd.s32 48, %v2274_v49 }
  0xef   : > { %v811_v60 = vpop.f32.mrf.mxu3 }
  0xf0   : > { %v2334_v57 = vadd.f32 %v1205_v41, %v1175_v56  ;;  %v1244_v58 = vmul.f32 %v1175_v56, %v1175_v56  ;;  %v684_v61 = vpop.f32.mrf.mxu0  ;;  %v812_v0 = vadd.f32 %v811_v60, %v722_v59 }
  0xf1   : > { %v773_v63 = vpop.f32.mrf.mxu1 }
  0xf2   : > { %v2336_v1 = vadd.f32 %v1274_v48, %v1244_v58  ;;  %v774_v2 = vadd.f32 %v773_v63, %v684_v61  ;;  %v2339_v3 = vadd.f32 %v2283_v51, %v812_v0  ;;  %v1014_v48 = vadd.s32 40, %v2274_v49 }
  0xf3   : > { %v1016_v63 = vadd.s32 56, %v2274_v49 }
  0xf4   : > { %v2342_v4 = vadd.f32 %v2283_v51, %v774_v2  ;;  %996 = vst [vmem:[%s2292_s30 + $0xa0] sm:$0xff] %v2339_v3  ;;  %v1048_v61 = vadd.s32 %v2278_v50, %v1014_v48 }
  0xf6   : > { %981 = vst [vmem:[%s2292_s30 + $0x28] sm:$0xff] %v2342_v4  ;;  %v724_v5 = vpop.f32.mrf.mxu2  ;;  %vm1080_vm5 = vcmp.lt.s32.totalorder %v1048_v61, 2048 }
  0xf7   : > { %v813_v7 = vpop.f32.mrf.mxu3 }
  0xf8   : > { %v687_v8 = vpop.f32.mrf.mxu0  ;;  %v814_v10 = vadd.f32 %v813_v7, %v724_v5  ;;  %v1049_v5 = vadd.s32 %v2278_v50, %v1015_v55  ;;  %v1017_v7 = vadd.s32 64, %v2274_v49 }
  0xf9   : > { %v776_v9 = vpop.f32.mrf.mxu1 }
  0xfa   : > { %v777_v11 = vadd.f32 %v776_v9, %v687_v8  ;;  %v2349_v12 = vadd.f32 %v2283_v51, %v814_v10  ;;  %v1025_v8 = vadd.s32 128, %v2274_v49  ;;  %v1050_v9 = vadd.s32 %v2278_v50, %v1016_v63 }
  0xfb   : > { %v1018_v10 = vadd.s32 72, %v2274_v49  ;;  %vm1081_vm6 = vcmp.lt.s32.totalorder %v1049_v5, 2048  ;;  %v1023_v63 = vadd.s32 112, %v2274_v49 }
  0xfc   : > { %v2352_v13 = vadd.f32 %v2283_v51, %v777_v11  ;;  %997 = vst [vmem:[%s2292_s30 + $0xa8] sm:$0xff] %v2349_v12  ;;  %vm1082_vm7 = vcmp.lt.s32.totalorder %v1050_v9, 2048 }
  0xfe   : > { %982 = vst [vmem:[%s2292_s30 + $0x30] sm:$0xff] %v2352_v13  ;;  %v727_v14 = vpop.f32.mrf.mxu2 }
  0xff   : > { %v816_v15 = vpop.f32.mrf.mxu3 }
 0x100   : > { %v689_v16 = vpop.f32.mrf.mxu0  ;;  %v817_v18 = vadd.f32 %v816_v15, %v727_v14  ;;  %v1051_v15 = vadd.s32 %v2278_v50, %v1017_v7 }
 0x101   : > { %v778_v17 = vpop.f32.mrf.mxu1 }
 0x102   : > { %v779_v19 = vadd.f32 %v778_v17, %v689_v16  ;;  %v2359_v20 = vadd.f32 %v2283_v51, %v817_v18  ;;  %v1019_v16 = vadd.s32 80, %v2274_v49  ;;  %vm1083_vm8 = vcmp.lt.s32.totalorder %v1051_v15, 2048 }
 0x104   : > { %v2362_v21 = vadd.f32 %v2283_v51, %v779_v19  ;;  %998 = vst [vmem:[%s2292_s30 + $0xb0] sm:$0xff] %v2359_v20 }
 0x106   : > { %983 = vst [vmem:[%s2292_s30 + $0x38] sm:$0xff] %v2362_v21  ;;  %v729_v23 = vpop.f32.mrf.mxu2 }
 0x107   : > { %v818_v24 = vpop.f32.mrf.mxu3 }
 0x108   : > { %v692_v25 = vpop.f32.mrf.mxu0  ;;  %v819_v27 = vadd.f32 %v818_v24, %v729_v23  ;;  %v1026_v23 = vadd.s32 136, %v2274_v49  ;;  %v1695_v24 = vsel %vm1080_vm5, 1.0, %v2067_v62 }
 0x109   : > { %v781_v26 = vpop.f32.mrf.mxu1 }
 0x10a   : > { %v782_v28 = vadd.f32 %v781_v26, %v692_v25  ;;  %v2369_v29 = vadd.f32 %v2283_v51, %v819_v27  ;;  %v1059_v26 = vadd.s32 %v2278_v50, %v1025_v8  ;;  %v1052_v27 = vadd.s32 %v2278_v50, %v1018_v10 }
 0x10c   : > { %v2372_v30 = vadd.f32 %v2283_v51, %v782_v28  ;;  %999 = vst [vmem:[%s2292_s30 + $0xb8] sm:$0xff] %v2369_v29  ;;  %vm1091_vm9 = vcmp.lt.s32.totalorder %v1059_v26, 2048  ;;  %vm1084_vm10 = vcmp.lt.s32.totalorder %v1052_v27, 2048  ;;  %v1024_v26 = vadd.s32 120, %v2274_v49 }
 0x10e   : > { %984 = vst [vmem:[%s2292_s30 + $0x40] sm:$0xff] %v2372_v30  ;;  %v732_v31 = vpop.f32.mrf.mxu2 }
 0x10f   : > { %v821_v32 = vpop.f32.mrf.mxu3 }
 0x110   : > { %v694_v33 = vpop.f32.mrf.mxu0  ;;  %v822_v35 = vadd.f32 %v821_v32, %v732_v31  ;;  %v1696_v31 = vsel %vm1081_vm6, 1.0, %v2067_v62  ;;  %v1020_v32 = vadd.s32 88, %v2274_v49 }
 0x111   : > { %v783_v34 = vpop.f32.mrf.mxu1 }
 0x112   : > { %v784_v36 = vadd.f32 %v783_v34, %v694_v33  ;;  %v2379_v38 = vadd.f32 %v2283_v51, %v822_v35  ;;  %v1176_v34 = vmul.f32 %v1695_v24, %v2342_v4  ;;  %v1053_v35 = vadd.s32 %v2278_v50, %v1019_v16 }
 0x113   : > { %v1027_v4 = vadd.s32 144, %v2274_v49 }
 0x114   : > { %v2382_v39 = vadd.f32 %v2283_v51, %v784_v36  ;;  %1000 = vst [vmem:[%s2292_s30 + $0xc0] sm:$0xff] %v2379_v38  ;;  %v1697_v36 = vsel %vm1082_vm7, 1.0, %v2067_v62  ;;  %vm1085_vm11 = vcmp.lt.s32.totalorder %v1053_v35, 2048  ;;  %v1207_v5 = vadd.f32 %v2334_v57, %v1176_v34 }
 0x115   : > { %v1178_v55 = vmul.f32 %v1697_v36, %v2362_v21  ;;  %v1700_v9 = vsel %vm1085_vm11, 1.0, %v2067_v62 }
 0x116   : > { %985 = vst [vmem:[%s2292_s30 + $0x48] sm:$0xff] %v2382_v39  ;;  %v734_v40 = vpop.f32.mrf.mxu2 }
 0x117   : > { %v823_v41 = vpop.f32.mrf.mxu3  ;;  %v1247_v57 = vmul.f32 %v1178_v55, %v1178_v55 }
 0x118   : > { %v697_v42 = vpop.f32.mrf.mxu0  ;;  %v824_v44 = vadd.f32 %v823_v41, %v734_v40  ;;  %v1021_v40 = vadd.s32 96, %v2274_v49  ;;  %v2440_v41 = vadd.s32 %v2278_v50, %v1026_v23 }
 0x119   : > { %v786_v43 = vpop.f32.mrf.mxu1 }
 0x11a   : > { %v787_v45 = vadd.f32 %v786_v43, %v697_v42  ;;  %v2389_v46 = vadd.f32 %v2283_v51, %v824_v44  ;;  %v1177_v42 = vmul.f32 %v1696_v31, %v2352_v13  ;;  %v1698_v43 = vsel %vm1083_vm8, 1.0, %v2067_v62 }
 0x11b   : > { %v1054_v44 = vadd.s32 %v2278_v50, %v1020_v32  ;;  %v1699_v13 = vsel %vm1084_vm10, 1.0, %v2067_v62  ;;  %vm1092_vm12 = vcmp.lt.s32.totalorder %v2440_v41, 2048  ;;  %v1179_v21 = vmul.f32 %v1698_v43, %v2372_v30 }
 0x11c   : > { %v2392_v47 = vadd.f32 %v2283_v51, %v787_v45  ;;  %1001 = vst [vmem:[%s2292_s30 + $0xc8] sm:$0xff] %v2389_v46  ;;  %v1022_v45 = vadd.s32 104, %v2274_v49  ;;  %v1246_v7 = vmul.f32 %v1177_v42, %v1177_v42  ;;  %v1180_v16 = vmul.f32 %v1699_v13, %v2382_v39 }
 0x11d   : > { %vm1086_vm13 = vcmp.lt.s32.totalorder %v1054_v44, 2048  ;;  %v1208_v30 = vadd.f32 %v1207_v5, %v1177_v42  ;;  %v1248_v23 = vmul.f32 %v1179_v21, %v1179_v21 }
 0x11e   : > { %986 = vst [vmem:[%s2292_s30 + $0x50] sm:$0xff] %v2392_v47  ;;  %v737_v52 = vpop.f32.mrf.mxu2  ;;  %v1181_v24 = vmul.f32 %v1700_v9, %v2392_v47 }
 0x11f   : > { %v826_v53 = vpop.f32.mrf.mxu3  ;;  %v1209_v39 = vadd.f32 %v1208_v30, %v1178_v55 }
 0x120   : > { %v699_v56 = vpop.f32.mrf.mxu0  ;;  %v827_v59 = vadd.f32 %v826_v53, %v737_v52  ;;  %v1245_v53 = vmul.f32 %v1176_v34, %v1176_v34  ;;  %v1249_v34 = vmul.f32 %v1180_v16, %v1180_v16 }
 0x121   : > { %v788_v58 = vpop.f32.mrf.mxu1  ;;  %v1210_v47 = vadd.f32 %v1209_v39, %v1179_v21  ;;  %v1030_v21 = vadd.s32 168, %v2274_v49  ;;  %v1032_v39 = vadd.s32 184, %v2274_v49 }
 0x122   : > { %v789_v60 = vadd.f32 %v788_v58, %v699_v56  ;;  %v2403_v0 = vadd.f32 %v2283_v51, %v827_v59  ;;  %v1276_v15 = vadd.f32 %v2336_v1, %v1245_v53  ;;  %v2473_v1 = vadd.s32 %v2278_v50, %v1027_v4 }
 0x123   : > { %v1211_v53 = vadd.f32 %v1210_v47, %v1180_v16  ;;  %v1033_v47 = vadd.s32 192, %v2274_v49 }
 0x124   : > { %v2406_v2 = vadd.f32 %v2283_v51, %v789_v60  ;;  %1002 = vst [vmem:[%s2292_s30 + $0xd0] sm:$0xff] %v2403_v0  ;;  %v1055_v60 = vadd.s32 %v2278_v50, %v1021_v40  ;;  %vm1093_vm1 = vcmp.lt.s32.totalorder %v2473_v1, 2048  ;;  %v1066_v1 = vadd.s32 %v2278_v50, %v1032_v39 }
 0x126   : > { %987 = vst [vmem:[%s2292_s30 + $0x58] sm:$0xff] %v2406_v2  ;;  %v739_v11 = vpop.f32.mrf.mxu2  ;;  %vm1087_vm14 = vcmp.lt.s32.totalorder %v1055_v60, 2048  ;;  %vm1098_vm7 = vcmp.lt.s32.totalorder %v1066_v1, 2048 }
 0x127   : > { %v828_v14 = vpop.f32.mrf.mxu3  ;;  %v1702_v35 = vsel %vm1087_vm14, 1.0, %v2067_v62 }
 0x128   : > { %v702_v17 = vpop.f32.mrf.mxu0  ;;  %v829_v19 = vadd.f32 %v828_v14, %v739_v11  ;;  %v1056_v11 = vadd.s32 %v2278_v50, %v1022_v45  ;;  %v1706_v14 = vsel %vm1091_vm9, 1.0, %v2067_v62  ;;  %v1250_v45 = vmul.f32 %v1181_v24, %v1181_v24 }
 0x129   : > { %v791_v18 = vpop.f32.mrf.mxu1 }
 0x12a   : > { %v792_v25 = vadd.f32 %v791_v18, %v702_v17  ;;  %v2424_v28 = vadd.f32 %v2283_v51, %v829_v19  ;;  %v1028_v17 = vadd.s32 152, %v2274_v49  ;;  %v1057_v18 = vadd.s32 %v2278_v50, %v1023_v63 }
 0x12b   : > { %v1277_v19 = vadd.f32 %v1276_v15, %v1246_v7  ;;  %vm1088_vm15 = vcmp.lt.s32.totalorder %v1056_v11, 2048  ;;  %v1212_v63 = vadd.f32 %v1211_v53, %v1181_v24  ;;  %v1187_v7 = vmul.f32 %v1706_v14, %v2300_v6 }
 0x12c   : > { %v2429_v33 = vadd.f32 %v2283_v51, %v792_v25  ;;  %1003 = vst [vmem:[%s2292_s30 + $0xd8] sm:$0xff] %v2424_v28  ;;  %v1701_v25 = vsel %vm1086_vm13, 1.0, %v2067_v62  ;;  %vm1089_vm0 = vcmp.lt.s32.totalorder %v1057_v18, 2048  ;;  %v1034_v53 = vadd.s32 200, %v2274_v49 }
 0x12d   : > { %v1278_v32 = vadd.f32 %v1277_v19, %v1247_v57  ;;  %v1182_v43 = vmul.f32 %v1701_v25, %v2406_v2  ;;  %v1062_v2 = vadd.s32 %v2278_v50, %v1028_v17  ;;  %v1704_v60 = vsel %vm1089_vm0, 1.0, %v2067_v62 }
 0x12e   : > { %988 = vst [vmem:[%s2292_s30 + $0x60] sm:$0xff] %v2429_v33  ;;  %v742_v48 = vpop.f32.mrf.mxu2  ;;  %v1183_v55 = vmul.f32 %v1702_v35, %v2429_v33  ;;  %v1031_v17 = vadd.s32 176, %v2274_v49  ;;  %v1064_v25 = vadd.s32 %v2278_v50, %v1030_v21 }
 0x12f   : > { %v831_v52 = vpop.f32.mrf.mxu3  ;;  %v1279_v4 = vadd.f32 %v1278_v32, %v1248_v23  ;;  %v1251_v5 = vmul.f32 %v1182_v43, %v1182_v43  ;;  %v1213_v11 = vadd.f32 %v1212_v63, %v1182_v43  ;;  %vm1094_vm3 = vcmp.lt.s32.totalorder %v1062_v2, 2048 }
 0x130   : > { %v704_v56 = vpop.f32.mrf.mxu0  ;;  %v832_v59 = vadd.f32 %v831_v52, %v742_v48  ;;  %v1703_v48 = vsel %vm1088_vm15, 1.0, %v2067_v62  ;;  %v1252_v15 = vmul.f32 %v1183_v55, %v1183_v55  ;;  %vm1096_vm5 = vcmp.lt.s32.totalorder %v1064_v25, 2048 }
 0x131   : > { %v793_v58 = vpop.f32.mrf.mxu1  ;;  %v1280_v13 = vadd.f32 %v1279_v4, %v1249_v34  ;;  %v1214_v19 = vadd.f32 %v1213_v11, %v1183_v55  ;;  %v1035_v63 = vadd.s32 208, %v2274_v49 }
 0x132   : > { %v794_v61 = vadd.f32 %v793_v58, %v704_v56  ;;  %v2455_v8 = vadd.f32 %v2283_v51, %v832_v59  ;;  %v1058_v58 = vadd.s32 %v2278_v50, %v1024_v26  ;;  %v1029_v59 = vadd.s32 160, %v2274_v49 }
 0x133   : > { %v1281_v9 = vadd.f32 %v1280_v13, %v1250_v45 }
 0x134   : > { %v957_v10 = vadd.f32 %v2283_v51, %v794_v61  ;;  %1004 = vst [vmem:[%s2292_s30 + $0xe0] sm:$0xff] %v2455_v8  ;;  %v1707_v61 = vsel %vm1092_vm12, 1.0, %v2067_v62  ;;  %vm1090_vm2 = vcmp.lt.s32.totalorder %v1058_v58, 2048  ;;  %v1063_v41 = vadd.s32 %v2278_v50, %v1029_v59 }
 0x135   : > { %v1282_v14 = vadd.f32 %v1281_v9, %v1251_v5  ;;  %v1705_v26 = vsel %vm1090_vm2, 1.0, %v2067_v62  ;;  %v1188_v45 = vmul.f32 %v1707_v61, %v2309_v22  ;;  %v1067_v61 = vadd.s32 %v2278_v50, %v1033_v47 }
 0x136   : > { %989 = vst [vmem:[%s2292_s30 + $0x68] sm:$0xff] %v957_v10  ;;  %v744_v27 = vpop.f32.mrf.mxu2  ;;  %v1184_v33 = vmul.f32 %v1703_v48, %v957_v10  ;;  %vm1095_vm4 = vcmp.lt.s32.totalorder %v1063_v41, 2048  ;;  %v1709_v48 = vsel %vm1094_vm3, 1.0, %v2067_v62  ;;  %v1036_v41 = vadd.s32 216, %v2274_v49 }
 0x137   : > { %v833_v31 = vpop.f32.mrf.mxu3  ;;  %v1710_v22 = vsel %vm1095_vm4, 1.0, %v2067_v62  ;;  %v1257_v21 = vmul.f32 %v1188_v45, %v1188_v45  ;;  %v1190_v9 = vmul.f32 %v1709_v48, %v2328_v54  ;;  %vm1099_vm8 = vcmp.lt.s32.totalorder %v1067_v61, 2048 }
 0x138   : > { %v707_v36 = vpop.f32.mrf.mxu0  ;;  %v834_v42 = vadd.f32 %v833_v31, %v744_v27  ;;  %v1253_v23 = vmul.f32 %v1184_v33, %v1184_v33  ;;  %v1283_v31 = vadd.f32 %v1282_v14, %v1252_v15  ;;  %v1215_v32 = vadd.f32 %v1214_v19, %v1184_v33 }
 0x139   : > { %v796_v40 = vpop.f32.mrf.mxu1 }
 0x13a   : > { %v797_v44 = vadd.f32 %v796_v40, %v707_v36  ;;  %v2481_v52 = vadd.f32 %v2283_v51, %v834_v42  ;;  %v1256_v36 = vmul.f32 %v1187_v7, %v1187_v7  ;;  %v1708_v40 = vsel %vm1093_vm1, 1.0, %v2067_v62 }
 0x13b   : > { %v1065_v42 = vadd.s32 %v2278_v50, %v1031_v17  ;;  %v1284_v43 = vadd.f32 %v1283_v31, %v1253_v23 }
 0x13c   : > { %v958_v56 = vadd.f32 %v2283_v51, %v797_v44  ;;  %1005 = vst [vmem:[%s2292_s30 + $0xe8] sm:$0xff] %v2481_v52 }
 0x13d   : > { %vm1097_vm6 = vcmp.lt.s32.totalorder %v1065_v42, 2048 }
 0x13e   : > { %990 = vst [vmem:[%s2292_s30 + $0x70] sm:$0xff] %v958_v56  ;;  %v1185_v57 = vmul.f32 %v1704_v60, %v958_v56  ;;  %v747_v16 = vpop.f32.mrf.mxu2  ;;  %v1189_v60 = vmul.f32 %v1708_v40, %v2319_v37  ;;  %v1711_v37 = vsel %vm1096_vm5, 1.0, %v2067_v62  ;;  %v1712_v54 = vsel %vm1097_vm6, 1.0, %v2067_v62 }
 0x13f   : > { %v836_v30 = vpop.f32.mrf.mxu3 }
 0x140   : > { %v709_v10 = vpop.f32.mrf.mxu0  ;;  %v837_v6 = vadd.f32 %v836_v30, %v747_v16  ;;  %v1254_v34 = vmul.f32 %v1185_v57, %v1185_v57  ;;  %v1216_v44 = vadd.f32 %v1215_v32, %v1185_v57  ;;  %v1258_v16 = vmul.f32 %v1189_v60, %v1189_v60 }
 0x141   : > { %v798_v18 = vpop.f32.mrf.mxu1  ;;  %v1191_v30 = vmul.f32 %v1710_v22, %v2339_v3 }
 0x142   : > { %v799_v24 = vadd.f32 %v798_v18, %v709_v10  ;;  %v2504_v27 = vadd.f32 %v2283_v51, %v837_v6  ;;  %v1285_v55 = vadd.f32 %v1284_v43, %v1254_v34 }
 0x144   : > { %v959_v35 = vadd.f32 %v2283_v51, %v799_v24  ;;  %1006 = vst [vmem:[%s2292_s30 + $0xf0] sm:$0xff] %v2504_v27 }
 0x146   : > { %991 = vst [vmem:[%s2292_s30 + $0x78] sm:$0xff] %v959_v35  ;;  %v1186_v4 = vmul.f32 %v1705_v26, %v959_v35  ;;  %v749_v59 = vpop.f32.mrf.mxu2 }
 0x147   : > { %v838_v13 = vpop.f32.mrf.mxu3 }
 0x148   : > { %v1217_v56 = vadd.f32 %v1216_v44, %v1186_v4  ;;  %v1255_v58 = vmul.f32 %v1186_v4, %v1186_v4  ;;  %v839_v2 = vadd.f32 %v838_v13, %v749_v59 }
 0x14a   : > { %v1218_v5 = vadd.f32 %v1217_v56, %v1187_v7  ;;  %v1286_v33 = vadd.f32 %v1285_v55, %v1255_v58  ;;  %v2542_v11 = vadd.f32 %v2283_v51, %v839_v2  ;;  %v1068_v7 = vadd.s32 %v2278_v50, %v1034_v53 }
 0x14b   : > { %v1069_v51 = vadd.s32 %v2278_v50, %v1035_v63 }
 0x14c   : > { %v1219_v15 = vadd.f32 %v1218_v5, %v1188_v45  ;;  %v1287_v57 = vadd.f32 %v1286_v33, %v1256_v36  ;;  %1007 = vst [vmem:[%s2292_s30 + $0xf8] sm:$0xff] %v2542_v11 }
 0x14e   : > { %v1220_v17 = vadd.f32 %v1219_v15, %v1189_v60  ;;  %v1288_v10 = vadd.f32 %v1287_v57, %v1257_v21 }
 0x14f   : > { %1969 = shalt.err (!%p1966_p12)
}
 0x150   : > { %s2068_s1 = smov 128   ;;  %s2069_s23 = smov 8   ;;  %v1259_v3 = vmul.f32 %v1190_v9, %v1190_v9  ;;  %v1192_v18 = vmul.f32 %v1711_v37, %v2349_v12  ;;  %v1713_v6 = vsel %vm1098_vm7, 1.0, %v2067_v62  ;;  %vm1100_vm9 = vcmp.lt.s32.totalorder %v1068_v7, 2048 }
 0x151   : > { %1802 = dma.vmem_to_hbm [thread:$0]  (%p2173_p3), %s2534_s28, 4096, %s2536_s29, %s1320_s5, %s2068_s1, %s2068_s1, %s2069_s23   ;;  %v1221_v14 = vadd.f32 %v1220_v17, %v1190_v9  ;;  %v1289_v19 = vadd.f32 %v1288_v10, %v1258_v16  ;;  %v1037_v23 = vadd.s32 224, %v2274_v49  ;;  %v1260_v24 = vmul.f32 %v1191_v30, %v1191_v30 }
 0x152   : > { %v1193_v25 = vmul.f32 %v1712_v54, %v2359_v20  ;;  %v1714_v39 = vsel %vm1099_vm8, 1.0, %v2067_v62  ;;  %v1070_v26 = vadd.s32 %v2278_v50, %v1036_v41  ;;  %vm1101_vm10 = vcmp.lt.s32.totalorder %v1069_v51, 2048  ;;  %s1496_s25 = sshll.u32 %s2193_s10, 3  ;;  %s1726_s30 = sshll.u32 %s2052_s18, 3 }
 0x153   : > { %v1222_v31 = vadd.f32 %v1221_v14, %v1191_v30  ;;  %v1290_v32 = vadd.f32 %v1289_v19, %v1259_v3  ;;  %v1038_v12 = vadd.s32 232, %v2274_v49  ;;  %v1261_v34 = vmul.f32 %v1192_v18, %v1192_v18  ;;  %s1352_s14 = scalar_lea.hbm %s2641_s4, %s1726_s30  ;;  %s270_s28 = scalar_lea.vmem [#allocation9], %s1496_s25 }
 0x154   : > { %v1194_v35 = vmul.f32 %v1713_v6, %v2369_v29  ;;  %v1715_v36 = vsel %vm1100_vm9, 1.0, %v2067_v62  ;;  %v1071_v47 = vadd.s32 %v2278_v50, %v1037_v23  ;;  %v1039_v20 = vadd.s32 240, %v2274_v49  ;;  %s1354_s29 = sshll.u32 %s270_s28, 4  ;;  %s1356_s5 = sshll.u32 %s1352_s14, 4  ;;  %s1355_s29 = int_to_ptr.vmem [resolvable:$true] %s1354_s29  ;;  %s1357_s5 = int_to_ptr.hbm [resolvable:$true] %s1356_s5 }
 0x155   : > { %v1223_v40 = vadd.f32 %v1222_v31, %v1192_v18  ;;  %v1291_v42 = vadd.f32 %v1290_v32, %v1260_v24  ;;  %v1262_v43 = vmul.f32 %v1193_v25, %v1193_v25  ;;  %v1195_v44 = vmul.f32 %v1714_v39, %v2379_v38  ;;  %s1325_s18 = scalar_lea.sflag [#allocation10], %s2193_s10  ;;  %s1984_s6 = sshra.s32 %s1357_s5, 4  ;;  %s1985_s6 = int_to_ptr.hbm [resolvable:$true] %s1984_s6 }
 0x156   : > { %v1716_v4 = vsel %vm1101_vm10, 1.0, %v2067_v62  ;;  %vm1102_vm11 = vcmp.lt.s32.totalorder %v1070_v26, 2048  ;;  %v1072_v1 = vadd.s32 %v2278_v50, %v1038_v12  ;;  %v1040_v29 = vadd.s32 248, %v2274_v49  ;;  %s1986_s7 = scalar_lea.hbm %s1985_s6, 8  ;;  %s1990_s13 = scalar_lea.hbm %s2641_s4, 64 }
 0x157   : > { %v1292_v45 = vadd.f32 %v1291_v42, %v1261_v34  ;;  %v1224_v48 = vadd.f32 %v1223_v40, %v1193_v25  ;;  %v1263_v53 = vmul.f32 %v1194_v35, %v1194_v35  ;;  %v1196_v55 = vmul.f32 %v1715_v36, %v2389_v46  ;;  %p1987_p13 = scmp.ne.s32.totalorder %s1985_s6, %s1986_s7  ;;  %p1991_p7 = scmp.lt.s32.totalorder %s1985_s6, %s2641_s4 }
 0x158   : > { %vm1103_vm12 = vcmp.lt.s32.totalorder %v1071_v47, 2048  ;;  %v1073_v59 = vadd.s32 %v2278_v50, %v1039_v20  ;;  %v1264_v13 = vmul.f32 %v1195_v44, %v1195_v44  ;;  %v1197_v38 = vmul.f32 %v1716_v4, %v2403_v0  ;;  %p1992_p2 = scmp.lt.s32.totalorder %s1990_s13, %s1986_s7 }
 0x159   : > { %v1225_v56 = vadd.f32 %v1224_v48, %v1194_v35  ;;  %v1293_v58 = vadd.f32 %v1292_v45, %v1262_v43  ;;  %v1717_v60 = vsel %vm1102_vm11, 1.0, %v2067_v62  ;;  %vm1104_vm13 = vcmp.lt.s32.totalorder %v1072_v1, 2048  ;;  %p1988_p0 = pnand %p1987_p13, %p2173_p3 }
 0x15a   : > { %v1074_v61 = vadd.s32 %v2278_v50, %v1040_v29  ;;  %v1265_v63 = vmul.f32 %v1196_v55, %v1196_v55  ;;  %v1718_v5 = vsel %vm1103_vm12, 1.0, %v2067_v62  ;;  %v1198_v46 = vmul.f32 %v1717_v60, %v2424_v28  ;;  %p1993_p1 = por %p1992_p2, %p1991_p7 }
 0x15b   : > { %v1226_v22 = vadd.f32 %v1225_v56, %v1195_v44  ;;  %v1294_v2 = vadd.f32 %v1293_v58, %v1263_v53  ;;  %vm1105_vm14 = vcmp.lt.s32.totalorder %v1073_v59, 2048  ;;  %v1266_v9 = vmul.f32 %v1197_v38, %v1197_v38  ;;  %p1989_p5 = pneg %p1988_p0 }
 0x15c   : > { %v1719_v37 = vsel %vm1104_vm13, 1.0, %v2067_v62  ;;  %v1199_v0 = vmul.f32 %v1718_v5, %v2455_v8  ;;  %vm1106_vm15 = vcmp.lt.s32.totalorder %v1074_v61, 2048  ;;  %v1720_v57 = vsel %vm1105_vm14, 1.0, %v2067_v62 }
 0x15d   : > { %v1227_v33 = vadd.f32 %v1226_v22, %v1196_v55  ;;  %v1295_v21 = vadd.f32 %v1294_v2, %v1264_v13  ;;  %v1267_v16 = vmul.f32 %v1198_v46, %v1198_v46  ;;  %v1200_v54 = vmul.f32 %v1719_v37, %v2481_v52  ;;  %p1994_p4 = pnand %p1993_p1, %p1989_p5 }
 0x15e   : > { %v1721_v28 = vsel %vm1106_vm15, 1.0, %v2067_v62  ;;  %v1268_v51 = vmul.f32 %v1199_v0, %v1199_v0  ;;  %v1201_v10 = vmul.f32 %v1720_v57, %v2504_v27  ;;  %vm1309_vm0 = vcmp.eq.s32.totalorder %v2274_v49, 0 }
 0x15f   : > { %v1228_v7 = vadd.f32 %v1227_v33, %v1197_v38  ;;  %v1296_v15 = vadd.f32 %v1295_v21, %v1265_v63  ;;  %v1269_v8 = vmul.f32 %v1200_v54, %v1200_v54  ;;  %v1202_v6 = vmul.f32 %v1721_v28, %v2542_v11 }
 0x160   : > { %v1270_v23 = vmul.f32 %v1201_v10, %v1201_v10  ;;  %vm1313_vm1 = vcmp.eq.s32.totalorder %v2274_v49, 1 }
 0x161   : > { %v1229_v50 = vadd.f32 %v1228_v7, %v1198_v46  ;;  %v1297_v30 = vadd.f32 %v1296_v15, %v1266_v9  ;;  %v1271_v52 = vmul.f32 %v1202_v6, %v1202_v6 }
 0x163   : > { %v1230_v41 = vadd.f32 %v1229_v50, %v1199_v0  ;;  %v1298_v17 = vadd.f32 %v1297_v30, %v1267_v16 }
 0x165   : > { %v1299_v3 = vadd.f32 %v1298_v17, %v1268_v51  ;;  %v1231_v18 = vadd.f32 %v1230_v41, %v1200_v54 }
 0x167   : > { %v1300_v14 = vadd.f32 %v1299_v3, %v1269_v8  ;;  %v1232_v19 = vadd.f32 %v1231_v18, %v1201_v10 }
 0x169   : > { %v1301_v24 = vadd.f32 %v1300_v14, %v1270_v23  ;;  %v1233_v25 = vadd.f32 %v1232_v19, %v1202_v6 }
 0x16b   : > { %v1234_v39 = vrot.slane %v1233_v25, 4  ;;  %v1302_v62 = vadd.f32 %v1301_v24, %v1271_v52 }
 0x16d   : > { %v1235_v26 = vadd.f32 %v1234_v39, %v1233_v25  ;;  %v1303_v31 = vrot.slane %v1302_v62, 4 }
 0x16f   : > { %v1236_v32 = vrot.slane %v1235_v26, 2  ;;  %v1304_v12 = vadd.f32 %v1303_v31, %v1302_v62 }
 0x171   : > { %v1237_v27 = vadd.f32 %v1236_v32, %v1235_v26  ;;  %v1305_v34 = vrot.slane %v1304_v12, 2 }
 0x173   : > { %v1238_v35 = vrot.slane %v1237_v27, 1  ;;  %v1306_v36 = vadd.f32 %v1305_v34, %v1304_v12 }
 0x175   : > { %v1239_v11 = vadd.f32 %v1238_v35, %v1237_v27  ;;  %v1307_v40 = vrot.slane %v1306_v36, 1 }
 0x177   : > { %v1308_v42 = vadd.f32 %v1307_v40, %v1306_v36  ;;  %v1312_v47 = vsel %vm1309_vm0, %v1239_v11, 0.0 }
 0x179   : > { %v1316_v20 = vsel %vm1313_vm1, %v1308_v42, 0.0 }
 0x17a   : > { %v1317_v43 = vadd.f32 %v1316_v20, %v1312_v47 }
 0x17c   : > { %1318 = vst [vmem:[%s270_s28] sm:$0xff] %v1317_v43 }
 0x17d   : > { %1997 = shalt.err (!%p1994_p4)
}
 0x17e   : > { %1803 = dma.vmem_to_hbm [thread:$0]  (%p2173_p3), %s1355_s29, 128, %s1357_s5, %s1325_s18  }
 0x17f PF: > { %p1824_p8 = scmp.ge.s32.totalorder %s2060_s20, 2  ;;  %s1368_s10 = sand.u32 1, %s2040_s15  }
 0x180   : > { %s1369_s1 = scalar_lea.sflag [#allocation5], %s1368_s10 }
 0x181   : > { %p1815_p9 = pnand %p1824_p8, %p2144_p6 }
 0x183   : > { %p1816_p10 = pneg %p1815_p9 }
 0x185   : > { %2031 = dma.done.wait (%p1816_p10), %s1369_s1, 4096  }
 0x186   : > { %2033 = vsyncadd (%p1816_p10), %s1369_s1, 4294963200  ;;  %s1379_s23 = scalar_lea.sflag [#allocation10], %s1368_s10 }
 0x187   : > { %2035 = dma.done.wait (%p1816_p10), %s1379_s23, 128  }
 0x188   : > { %2037 = vsyncadd (%p1816_p10), %s1379_s23, 4294967168  ;;  %s25_s20 = sadd.s32 1, %s2060_s20   ;;  %s2653_s12 = sld [smem:[#allocation15_spill]] }
 0x189   : > { %p22_p11 = scmp.ge.s32.totalorder %s25_s20, 10   ;;  %s2654_s15 = smov %s2044_s16 }
 0x18a   : > { %s2655_s16 = smov %s2048_s17  ;;  %s2656_s17 = smov %s2182_s22 }
 0x18b   : > { %s2657_s18 = smov %s2056_s19  ;;  %24 = sbr.rel (!%p22_p11) target bundleno = 11 (0xb), region = 107 }
 0x18e   : > { %s2658_s19 = smov %s2653_s12 }
 0x190   :  { %1385 = vsyncpa [#allocation4], 1 }
 0x191   :  { %1387 = vsyncpa [#allocation4 + $0x1], 1 }
 0x192   :  { %1388 = vsyncpa [#allocation7], 1 }
 0x193   :  { %1389 = vsyncpa [#allocation5], 1 }
 0x194   :  { %1391 = vsyncpa [#allocation5 + $0x1], 1 }
 0x195   :  { %1392 = vsyncpa [#allocation10], 1 }
 0x196   :  { %1394 = vsyncpa [#allocation10 + $0x1], 1 }

</bundles_post_ra>
